<compile_context>
chip_gen: v7x
topology: tpu7x:2x2x1
jax: 0.10.0
libtpu: 0.0.40
codegen_flags: <defaults>
</compile_context>

<pallas_src>
import jax
import jax.numpy as jnp
from jax.experimental import pallas as pl
from jax.experimental.pallas import tpu as pltpu


def _relation_kernel(node_ref, edge_ref, path_ref, mask_ref,
                     ln_g_ref, ln_b_ref,
                     wq_ref, bq_ref, wk_ref, bk_ref, wv_ref, bv_ref,
                     me_ref, mp_ref, wt_ref, wo_ref, bo_ref,
                     out_ref):
    f32 = jnp.float32
    L, H = node_ref.shape
    TQ, _, d = edge_ref.shape
    m = H // d
    qi = pl.program_id(1)

    gamma = ln_g_ref[...]                                  # (1, H)
    beta = ln_b_ref[...]                                   # (1, H)

    def layernorm(x):
        mu = jnp.mean(x, axis=-1, keepdims=True)
        var = jnp.mean((x - mu) ** 2, axis=-1, keepdims=True)
        return (x - mu) * jax.lax.rsqrt(var + 1e-5) * gamma + beta

    # K / V need the full sequence; Q only needs the current query tile.
    x_full = layernorm(node_ref[...].astype(f32))                        # (L, H)
    q_start = pl.multiple_of(qi * TQ, TQ)
    x_tile = layernorm(node_ref[pl.ds(q_start, TQ), :].astype(f32))      # (TQ, H)

    q = jnp.dot(x_tile, wq_ref[...], preferred_element_type=f32) + bq_ref[...]  # (TQ, d)
    k = jnp.dot(x_full, wk_ref[...], preferred_element_type=f32) + bk_ref[...]  # (L, d)
    v = jnp.dot(x_full, wv_ref[...], preferred_element_type=f32) + bv_ref[...]  # (L, H)

    nt = (((1,), (1,)), ((), ()))     # contract minor dims of both operands (A @ B^T)

    # Post-talking score term: S[r, i, j] = sum_s Wt[r, s] * q[i, s] * k[j, s]
    qw = wt_ref[...][:, None, :] * q[None, :, :]                         # (d, TQ, d)
    scores = jax.lax.dot_general(qw.reshape(d * TQ, d), k, nt,
                                 preferred_element_type=f32)             # (d*TQ, L)
    scores = scores.reshape(d, TQ, L)

    # Edge / path terms with the talking-heads weight pre-folded host-side:
    #   E[r, (i,j)] = sum_u (Wt@We)[r, u] * edge[i, j, u]
    edge2 = edge_ref[...].astype(f32).reshape(TQ * L, d)
    path2 = path_ref[...].astype(f32).reshape(TQ * L, d)
    ep = (jax.lax.dot_general(me_ref[...], edge2, nt, preferred_element_type=f32) +
          jax.lax.dot_general(mp_ref[...], path2, nt, preferred_element_type=f32))

    # Relation in (d, TQ, L): keys j in the lane dimension.
    rel = scores + ep.reshape(d, TQ, L) + mask_ref[...]                  # mask (1, L) bcast

    # Softmax over keys (lane axis); normalization deferred past the attention matmul.
    rel_max = jnp.max(rel, axis=-1, keepdims=True)                       # (d, TQ, 1)
    p = jnp.exp(rel - rel_max)                                           # (d, TQ, L)
    denom = jnp.sum(p, axis=-1, keepdims=True)                           # (d, TQ, 1)

    # Attention: per head r, (TQ, L) @ (L, m) with K = L.
    v_h = jnp.transpose(v.reshape(L, d, m), (1, 0, 2))                   # (d, L, m)
    acc = jax.lax.dot_general(p, v_h, (((2,), (1,)), ((0,), (0,))),
                              preferred_element_type=f32)                # (d, TQ, m)
    acc = acc * pl.reciprocal(denom, approx=False)                       # deferred softmax norm
    ctx = jnp.transpose(acc, (1, 0, 2)).reshape(TQ, H)                   # (TQ, H)

    out = jnp.dot(ctx, wo_ref[...], preferred_element_type=f32) + bo_ref[...]
    out_ref[...] = out.astype(out_ref.dtype)


def _pick_q_tile(L):
    for t in (256, 128, 64, 32, 16, 8):
        if L % t == 0:
            return t
    return L


def relation_forward(params, node, edge, path, rel_mask, *, d_relation, q_tile=None):
    B, L, H = node.shape
    d = d_relation
    assert H % d == 0
    if q_tile is None:
        q_tile = _pick_q_tile(L)
    TQ = min(q_tile, L)
    assert L % TQ == 0 and (TQ == L or TQ % 8 == 0)
    nq = L // TQ
    f32 = jnp.float32

    # Host-side weight prep: pre-transpose to (in, out), fold talking into edge/path.
    wq_t = params['wq'].T.astype(f32)
    wk_t = params['wk'].T.astype(f32)
    wv_t = params['wv'].T.astype(f32)
    wo_t = params['wo'].T.astype(f32)
    m_e = (params['wt'] @ params['we']).astype(f32)
    m_p = (params['wt'] @ params['wp']).astype(f32)
    mask2 = rel_mask.reshape(B, 1, L).astype(f32)

    weights = [params['ln_g'], params['ln_b'], wq_t, params['bq'], wk_t, params['bk'],
               wv_t, params['bv'], m_e, m_p, params['wt'].astype(f32), wo_t, params['bo']]

    in_specs = ([
        pl.BlockSpec((None, L, H), lambda b, qi: (b, 0, 0)),          # node (full seq)
        pl.BlockSpec((None, TQ, L, d), lambda b, qi: (b, qi, 0, 0)),  # edge query tile
        pl.BlockSpec((None, TQ, L, d), lambda b, qi: (b, qi, 0, 0)),  # path query tile
        pl.BlockSpec((None, 1, L), lambda b, qi: (b, 0, 0)),          # key mask
    ] + [pl.BlockSpec(w.shape, lambda b, qi: (0, 0)) for w in weights])

    return pl.pallas_call(
        _relation_kernel,
        out_shape=jax.ShapeDtypeStruct((B, L, H), node.dtype),
        grid_spec=pltpu.PrefetchScalarGridSpec(
            num_scalar_prefetch=0,
            grid=(B, nq),
            in_specs=in_specs,
            out_specs=pl.BlockSpec((None, TQ, H), lambda b, qi: (b, qi, 0)),
        ),
        compiler_params=pltpu.CompilerParams(
            dimension_semantics=("parallel", "parallel"),
            vmem_limit_bytes=64 * 1024 * 1024),
    )(node, edge, path, mask2, *weights)


def make_params(key, hidden_size, d_relation, gain):
    """Deterministic synthetic init mimicking the module's __init__ shapes."""
    H, d = hidden_size, d_relation

    def xavier(k, out_f, in_f, g):
        std = g * (2.0 / (in_f + out_f)) ** 0.5
        return std * jax.random.normal(k, (out_f, in_f), jnp.float32)

    ks = jax.random.split(key, 12)
    g_qk = 3.0 ** (-0.25)
    g_ep = 3.0 ** (-0.5)
    return {
        'ln_g': jnp.ones((1, H), jnp.float32),
        'ln_b': jnp.zeros((1, H), jnp.float32),
        'wq': xavier(ks[0], d, H, g_qk),
        'bq': 0.01 * jax.random.normal(ks[1], (1, d), jnp.float32),
        'wk': xavier(ks[2], d, H, g_qk),
        'bk': 0.01 * jax.random.normal(ks[3], (1, d), jnp.float32),
        'wv': xavier(ks[4], H, H, gain),
        'bv': 0.01 * jax.random.normal(ks[5], (1, H), jnp.float32),
        'we': xavier(ks[6], d, d, g_ep),
        'wp': xavier(ks[7], d, d, g_ep),
        'wt': xavier(ks[8], d, d, 1.0),
        'wo': xavier(ks[9], H, H, gain),
        'bo': 0.01 * jax.random.normal(ks[10], (1, H), jnp.float32),
    }


def reference(params, node, edge, path, rel_mask, d):
    """Pure-JAX reference matching the PyTorch forward exactly."""
    B, L, H = node.shape
    m = H // d
    mu = node.mean(-1, keepdims=True)
    var = ((node - mu) ** 2).mean(-1, keepdims=True)
    x = (node - mu) / jnp.sqrt(var + 1e-5) * params['ln_g'][0] + params['ln_b'][0]
    q = x @ params['wq'].T + params['bq'][0]                    # (B, L, d)
    k = x @ params['wk'].T + params['bk'][0]                    # (B, L, d)
    v = x @ params['wv'].T + params['bv'][0]                    # (B, L, H)
    scores = q[:, :, None, :] * k[:, None, :, :]                # (B, L, L, d)
    rel = scores + edge @ params['we'].T + path @ params['wp'].T
    rel = rel @ params['wt'].T
    rel = rel + rel_mask
    rel = jax.nn.softmax(rel, axis=2)
    v3 = v.reshape(B, L, d, m)
    ctx = jnp.einsum('bijr,bjrm->birm', rel, v3).reshape(B, L, H)
    return ctx @ params['wo'].T + params['bo'][0]


if __name__ == "__main__":
    B, L, H, D = 2, 16, 32, 8          # hidden=32, d_relation=8 (multiple of 8)
    key = jax.random.PRNGKey(0)
    k_node, k_edge, k_path, k_par = jax.random.split(key, 4)

    node = jax.random.normal(k_node, (B, L, H), jnp.float32)
    # edge / path streamed as bf16 in HBM (halves DMA bytes); kernel computes in f32.
    edge = jax.random.normal(k_edge, (B, L, L, D), jnp.float32).astype(jnp.bfloat16)
    path = jax.random.normal(k_path, (B, L, L, D), jnp.float32).astype(jnp.bfloat16)
    # mask last 3 key positions (0 = keep, -1e9 = drop), shape (B, 1, L, 1)
    keep = (jnp.arange(L) < L - 3)
    rel_mask = jnp.where(keep, 0.0, -1e9).astype(jnp.float32).reshape(1, 1, L, 1)
    rel_mask = jnp.broadcast_to(rel_mask, (B, 1, L, 1))

    params = make_params(k_par, H, D, gain=1.0)

    # q_tile=8 exercises the query-tiled grid (2 tiles per batch element).
    out = relation_forward(params, node, edge, path, rel_mask, d_relation=D, q_tile=8)
    out = jax.block_until_ready(out)

    ref = reference(params, node, edge.astype(jnp.float32), path.astype(jnp.float32),
                    rel_mask, D)
    max_err = float(jnp.max(jnp.abs(out - ref)))
    assert jnp.allclose(out, ref, atol=1e-4, rtol=1e-4), f"max_err={max_err}"
    print("KERNEL_OK")
</pallas_src>

<mosaic_0001>
module attributes {stable_mosaic.version = 11 : i64} {
  func.func @_relation_kernel(%arg0: i32, %arg1: i32, %arg2: memref<1x16x32xf32, #tpu.memory_space<vmem>>, %arg3: memref<1x8x16x8xbf16, #tpu.memory_space<vmem>>, %arg4: memref<1x8x16x8xbf16, #tpu.memory_space<vmem>>, %arg5: memref<1x1x16xf32, #tpu.memory_space<vmem>>, %arg6: memref<1x32xf32, #tpu.memory_space<vmem>>, %arg7: memref<1x32xf32, #tpu.memory_space<vmem>>, %arg8: memref<32x8xf32, #tpu.memory_space<vmem>>, %arg9: memref<1x8xf32, #tpu.memory_space<vmem>>, %arg10: memref<32x8xf32, #tpu.memory_space<vmem>>, %arg11: memref<1x8xf32, #tpu.memory_space<vmem>>, %arg12: memref<32x32xf32, #tpu.memory_space<vmem>>, %arg13: memref<1x32xf32, #tpu.memory_space<vmem>>, %arg14: memref<8x8xf32, #tpu.memory_space<vmem>>, %arg15: memref<8x8xf32, #tpu.memory_space<vmem>>, %arg16: memref<8x8xf32, #tpu.memory_space<vmem>>, %arg17: memref<32x32xf32, #tpu.memory_space<vmem>>, %arg18: memref<1x32xf32, #tpu.memory_space<vmem>>, %arg19: memref<1x8x32xf32, #tpu.memory_space<vmem>>) attributes {dimension_semantics = [#tpu.dimension_semantics<parallel>, #tpu.dimension_semantics<parallel>], iteration_bounds = array<i64: 2, 2>, scalar_prefetch = 0 : i64, scratch_operands = 0 : i64, tpu.core_type = #tpu.core_type<tc>, window_params = [{transform_indices = @transform_0, window_bounds = array<i64: 1, 16, 32>}, {transform_indices = @transform_1, window_bounds = array<i64: 1, 8, 16, 8>}, {transform_indices = @transform_2, window_bounds = array<i64: 1, 8, 16, 8>}, {transform_indices = @transform_3, window_bounds = array<i64: 1, 1, 16>}, {pipeline_mode = #tpu.pipeline_mode<synchronous>, transform_indices = @transform_4, window_bounds = array<i64: 1, 32>}, {pipeline_mode = #tpu.pipeline_mode<synchronous>, transform_indices = @transform_5, window_bounds = array<i64: 1, 32>}, {pipeline_mode = #tpu.pipeline_mode<synchronous>, transform_indices = @transform_6, window_bounds = array<i64: 32, 8>}, {pipeline_mode = #tpu.pipeline_mode<synchronous>, transform_indices = @transform_7, window_bounds = array<i64: 1, 8>}, {pipeline_mode = #tpu.pipeline_mode<synchronous>, transform_indices = @transform_8, window_bounds = array<i64: 32, 8>}, {pipeline_mode = #tpu.pipeline_mode<synchronous>, transform_indices = @transform_9, window_bounds = array<i64: 1, 8>}, {pipeline_mode = #tpu.pipeline_mode<synchronous>, transform_indices = @transform_10, window_bounds = array<i64: 32, 32>}, {pipeline_mode = #tpu.pipeline_mode<synchronous>, transform_indices = @transform_11, window_bounds = array<i64: 1, 32>}, {pipeline_mode = #tpu.pipeline_mode<synchronous>, transform_indices = @transform_12, window_bounds = array<i64: 8, 8>}, {pipeline_mode = #tpu.pipeline_mode<synchronous>, transform_indices = @transform_13, window_bounds = array<i64: 8, 8>}, {pipeline_mode = #tpu.pipeline_mode<synchronous>, transform_indices = @transform_14, window_bounds = array<i64: 8, 8>}, {pipeline_mode = #tpu.pipeline_mode<synchronous>, transform_indices = @transform_15, window_bounds = array<i64: 32, 32>}, {pipeline_mode = #tpu.pipeline_mode<synchronous>, transform_indices = @transform_16, window_bounds = array<i64: 1, 32>}, {transform_indices = @transform_17, window_bounds = array<i64: 1, 8, 32>}]} {
    %c0 = arith.constant 0 : index
    %c0_0 = arith.constant 0 : index
    %0 = vector.load %arg6[%c0, %c0_0] : memref<1x32xf32, #tpu.memory_space<vmem>>, vector<1x32xf32>
    %c0_1 = arith.constant 0 : index
    %c0_2 = arith.constant 0 : index
    %1 = vector.load %arg7[%c0_1, %c0_2] : memref<1x32xf32, #tpu.memory_space<vmem>>, vector<1x32xf32>
    %c0_3 = arith.constant 0 : index
    %c0_4 = arith.constant 0 : index
    %c0_5 = arith.constant 0 : index
    %2 = vector.load %arg2[%c0_3, %c0_4, %c0_5] : memref<1x16x32xf32, #tpu.memory_space<vmem>>, vector<1x16x32xf32>
    %3 = vector.shape_cast %2 : vector<1x16x32xf32> to vector<16x32xf32>
    %cst = arith.constant dense<0.000000e+00> : vector<16xf32>
    %4 = vector.multi_reduction <add>, %3, %cst [1] : vector<16x32xf32> to vector<16xf32>
    %5 = vector.shape_cast %4 : vector<16xf32> to vector<16x1xf32>
    %cst_6 = arith.constant 3.200000e+01 : f32
    %6 = vector.broadcast %cst_6 : f32 to vector<16x1xf32>
    %7 = arith.divf %5, %6 : vector<16x1xf32>
    %8 = vector.broadcast %7 : vector<16x1xf32> to vector<16x32xf32>
    %9 = arith.subf %3, %8 : vector<16x32xf32>
    %10 = arith.mulf %9, %9 : vector<16x32xf32>
    %cst_7 = arith.constant dense<0.000000e+00> : vector<16xf32>
    %11 = vector.multi_reduction <add>, %10, %cst_7 [1] : vector<16x32xf32> to vector<16xf32>
    %12 = vector.shape_cast %11 : vector<16xf32> to vector<16x1xf32>
    %cst_8 = arith.constant 3.200000e+01 : f32
    %13 = vector.broadcast %cst_8 : f32 to vector<16x1xf32>
    %14 = arith.divf %12, %13 : vector<16x1xf32>
    %15 = vector.broadcast %7 : vector<16x1xf32> to vector<16x32xf32>
    %16 = arith.subf %3, %15 : vector<16x32xf32>
    %cst_9 = arith.constant 9.99999974E-6 : f32
    %17 = vector.broadcast %cst_9 : f32 to vector<16x1xf32>
    %18 = arith.addf %14, %17 : vector<16x1xf32>
    %19 = math.rsqrt %18 : vector<16x1xf32>
    %20 = vector.broadcast %19 : vector<16x1xf32> to vector<16x32xf32>
    %21 = arith.mulf %16, %20 : vector<16x32xf32>
    %22 = vector.broadcast %0 : vector<1x32xf32> to vector<16x32xf32>
    %23 = arith.mulf %21, %22 : vector<16x32xf32>
    %24 = vector.broadcast %1 : vector<1x32xf32> to vector<16x32xf32>
    %25 = arith.addf %23, %24 : vector<16x32xf32>
    %c8_i32 = arith.constant 8 : i32
    %26 = arith.muli %arg1, %c8_i32 : i32
    %27 = tpu.assume_multiple %26, 8 : i32
    %c0_10 = arith.constant 0 : index
    %28 = arith.index_cast %27 : i32 to index
    %c0_11 = arith.constant 0 : index
    %29 = vector.load %arg2[%c0_10, %28, %c0_11] : memref<1x16x32xf32, #tpu.memory_space<vmem>>, vector<1x8x32xf32>
    %30 = vector.shape_cast %29 : vector<1x8x32xf32> to vector<8x32xf32>
    %cst_12 = arith.constant dense<0.000000e+00> : vector<8xf32>
    %31 = vector.multi_reduction <add>, %30, %cst_12 [1] : vector<8x32xf32> to vector<8xf32>
    %32 = vector.shape_cast %31 : vector<8xf32> to vector<8x1xf32>
    %cst_13 = arith.constant 3.200000e+01 : f32
    %33 = vector.broadcast %cst_13 : f32 to vector<8x1xf32>
    %34 = arith.divf %32, %33 : vector<8x1xf32>
    %35 = vector.broadcast %34 : vector<8x1xf32> to vector<8x32xf32>
    %36 = arith.subf %30, %35 : vector<8x32xf32>
    %37 = arith.mulf %36, %36 : vector<8x32xf32>
    %cst_14 = arith.constant dense<0.000000e+00> : vector<8xf32>
    %38 = vector.multi_reduction <add>, %37, %cst_14 [1] : vector<8x32xf32> to vector<8xf32>
    %39 = vector.shape_cast %38 : vector<8xf32> to vector<8x1xf32>
    %cst_15 = arith.constant 3.200000e+01 : f32
    %40 = vector.broadcast %cst_15 : f32 to vector<8x1xf32>
    %41 = arith.divf %39, %40 : vector<8x1xf32>
    %42 = vector.broadcast %34 : vector<8x1xf32> to vector<8x32xf32>
    %43 = arith.subf %30, %42 : vector<8x32xf32>
    %cst_16 = arith.constant 9.99999974E-6 : f32
    %44 = vector.broadcast %cst_16 : f32 to vector<8x1xf32>
    %45 = arith.addf %41, %44 : vector<8x1xf32>
    %46 = math.rsqrt %45 : vector<8x1xf32>
    %47 = vector.broadcast %46 : vector<8x1xf32> to vector<8x32xf32>
    %48 = arith.mulf %43, %47 : vector<8x32xf32>
    %49 = vector.broadcast %0 : vector<1x32xf32> to vector<8x32xf32>
    %50 = arith.mulf %48, %49 : vector<8x32xf32>
    %51 = vector.broadcast %1 : vector<1x32xf32> to vector<8x32xf32>
    %52 = arith.addf %50, %51 : vector<8x32xf32>
    %c0_17 = arith.constant 0 : index
    %c0_18 = arith.constant 0 : index
    %53 = vector.load %arg8[%c0_17, %c0_18] : memref<32x8xf32, #tpu.memory_space<vmem>>, vector<32x8xf32>
    %cst_19 = arith.constant dense<0.000000e+00> : vector<8x8xf32>
    %54 = tpu.matmul %52, %53, %cst_19 {dimension_numbers = #tpu.dot_dimension_numbers<[1], [0], [0], [1], [0, 0, 1, 1], [], []>} : vector<8x32xf32>, vector<32x8xf32>, vector<8x8xf32> -> vector<8x8xf32>
    %c0_20 = arith.constant 0 : index
    %c0_21 = arith.constant 0 : index
    %55 = vector.load %arg9[%c0_20, %c0_21] : memref<1x8xf32, #tpu.memory_space<vmem>>, vector<1x8xf32>
    %56 = vector.broadcast %55 : vector<1x8xf32> to vector<8x8xf32>
    %57 = arith.addf %54, %56 : vector<8x8xf32>
    %c0_22 = arith.constant 0 : index
    %c0_23 = arith.constant 0 : index
    %58 = vector.load %arg10[%c0_22, %c0_23] : memref<32x8xf32, #tpu.memory_space<vmem>>, vector<32x8xf32>
    %cst_24 = arith.constant dense<0.000000e+00> : vector<16x8xf32>
    %59 = tpu.matmul %25, %58, %cst_24 {dimension_numbers = #tpu.dot_dimension_numbers<[1], [0], [0], [1], [0, 0, 1, 1], [], []>} : vector<16x32xf32>, vector<32x8xf32>, vector<16x8xf32> -> vector<16x8xf32>
    %c0_25 = arith.constant 0 : index
    %c0_26 = arith.constant 0 : index
    %60 = vector.load %arg11[%c0_25, %c0_26] : memref<1x8xf32, #tpu.memory_space<vmem>>, vector<1x8xf32>
    %61 = vector.broadcast %60 : vector<1x8xf32> to vector<16x8xf32>
    %62 = arith.addf %59, %61 : vector<16x8xf32>
    %c0_27 = arith.constant 0 : index
    %c0_28 = arith.constant 0 : index
    %63 = vector.load %arg12[%c0_27, %c0_28] : memref<32x32xf32, #tpu.memory_space<vmem>>, vector<32x32xf32>
    %cst_29 = arith.constant dense<0.000000e+00> : vector<16x32xf32>
    %64 = tpu.matmul %25, %63, %cst_29 {dimension_numbers = #tpu.dot_dimension_numbers<[1], [0], [0], [1], [0, 0, 1, 1], [], []>} : vector<16x32xf32>, vector<32x32xf32>, vector<16x32xf32> -> vector<16x32xf32>
    %c0_30 = arith.constant 0 : index
    %c0_31 = arith.constant 0 : index
    %65 = vector.load %arg13[%c0_30, %c0_31] : memref<1x32xf32, #tpu.memory_space<vmem>>, vector<1x32xf32>
    %66 = vector.broadcast %65 : vector<1x32xf32> to vector<16x32xf32>
    %67 = arith.addf %64, %66 : vector<16x32xf32>
    %c0_32 = arith.constant 0 : index
    %c0_33 = arith.constant 0 : index
    %68 = vector.load %arg16[%c0_32, %c0_33] : memref<8x8xf32, #tpu.memory_space<vmem>>, vector<8x8xf32>
    %69 = vector.shape_cast %68 : vector<8x8xf32> to vector<8x1x8xf32>
    %70 = vector.shape_cast %57 : vector<8x8xf32> to vector<1x8x8xf32>
    %71 = vector.broadcast %69 : vector<8x1x8xf32> to vector<8x8x8xf32>
    %72 = vector.broadcast %70 : vector<1x8x8xf32> to vector<8x8x8xf32>
    %73 = arith.mulf %71, %72 : vector<8x8x8xf32>
    %74 = vector.shape_cast %73 : vector<8x8x8xf32> to vector<64x8xf32>
    %cst_34 = arith.constant dense<0.000000e+00> : vector<64x16xf32>
    %75 = tpu.matmul %74, %62, %cst_34 {dimension_numbers = #tpu.dot_dimension_numbers<[1], [1], [0], [0], [0, 0, 1, 0], [], []>} : vector<64x8xf32>, vector<16x8xf32>, vector<64x16xf32> -> vector<64x16xf32>
    %76 = vector.shape_cast %75 : vector<64x16xf32> to vector<8x8x16xf32>
    %c0_35 = arith.constant 0 : index
    %c0_36 = arith.constant 0 : index
    %c0_37 = arith.constant 0 : index
    %c0_38 = arith.constant 0 : index
    %77 = vector.load %arg3[%c0_35, %c0_36, %c0_37, %c0_38] : memref<1x8x16x8xbf16, #tpu.memory_space<vmem>>, vector<1x8x16x8xbf16>
    %78 = vector.shape_cast %77 : vector<1x8x16x8xbf16> to vector<8x16x8xbf16>
    %79 = arith.extf %78 : vector<8x16x8xbf16> to vector<8x16x8xf32>
    %80 = vector.shape_cast %79 : vector<8x16x8xf32> to vector<128x8xf32>
    %c0_39 = arith.constant 0 : index
    %c0_40 = arith.constant 0 : index
    %c0_41 = arith.constant 0 : index
    %c0_42 = arith.constant 0 : index
    %81 = vector.load %arg4[%c0_39, %c0_40, %c0_41, %c0_42] : memref<1x8x16x8xbf16, #tpu.memory_space<vmem>>, vector<1x8x16x8xbf16>
    %82 = vector.shape_cast %81 : vector<1x8x16x8xbf16> to vector<8x16x8xbf16>
    %83 = arith.extf %82 : vector<8x16x8xbf16> to vector<8x16x8xf32>
    %84 = vector.shape_cast %83 : vector<8x16x8xf32> to vector<128x8xf32>
    %c0_43 = arith.constant 0 : index
    %c0_44 = arith.constant 0 : index
    %85 = vector.load %arg14[%c0_43, %c0_44] : memref<8x8xf32, #tpu.memory_space<vmem>>, vector<8x8xf32>
    %cst_45 = arith.constant dense<0.000000e+00> : vector<8x128xf32>
    %86 = tpu.matmul %85, %80, %cst_45 {dimension_numbers = #tpu.dot_dimension_numbers<[1], [1], [0], [0], [0, 0, 1, 0], [], []>} : vector<8x8xf32>, vector<128x8xf32>, vector<8x128xf32> -> vector<8x128xf32>
    %c0_46 = arith.constant 0 : index
    %c0_47 = arith.constant 0 : index
    %87 = vector.load %arg15[%c0_46, %c0_47] : memref<8x8xf32, #tpu.memory_space<vmem>>, vector<8x8xf32>
    %cst_48 = arith.constant dense<0.000000e+00> : vector<8x128xf32>
    %88 = tpu.matmul %87, %84, %cst_48 {dimension_numbers = #tpu.dot_dimension_numbers<[1], [1], [0], [0], [0, 0, 1, 0], [], []>} : vector<8x8xf32>, vector<128x8xf32>, vector<8x128xf32> -> vector<8x128xf32>
    %89 = arith.addf %86, %88 : vector<8x128xf32>
    %90 = vector.shape_cast %89 : vector<8x128xf32> to vector<8x8x16xf32>
    %91 = arith.addf %76, %90 : vector<8x8x16xf32>
    %c0_49 = arith.constant 0 : index
    %c0_50 = arith.constant 0 : index
    %c0_51 = arith.constant 0 : index
    %92 = vector.load %arg5[%c0_49, %c0_50, %c0_51] : memref<1x1x16xf32, #tpu.memory_space<vmem>>, vector<1x1x16xf32>
    %93 = vector.shape_cast %92 : vector<1x1x16xf32> to vector<1x16xf32>
    %94 = vector.shape_cast %93 : vector<1x16xf32> to vector<1x1x16xf32>
    %95 = vector.broadcast %94 : vector<1x1x16xf32> to vector<8x8x16xf32>
    %96 = arith.addf %91, %95 : vector<8x8x16xf32>
    %cst_52 = arith.constant dense<0xFF800000> : vector<8x8xf32>
    %97 = vector.multi_reduction <maximumf>, %96, %cst_52 [2] : vector<8x8x16xf32> to vector<8x8xf32>
    %98 = vector.shape_cast %97 : vector<8x8xf32> to vector<8x8x1xf32>
    %99 = vector.broadcast %98 : vector<8x8x1xf32> to vector<8x8x16xf32>
    %100 = arith.subf %96, %99 : vector<8x8x16xf32>
    %101 = math.exp %100 : vector<8x8x16xf32>
    %cst_53 = arith.constant dense<0.000000e+00> : vector<8x8xf32>
    %102 = vector.multi_reduction <add>, %101, %cst_53 [2] : vector<8x8x16xf32> to vector<8x8xf32>
    %103 = vector.shape_cast %102 : vector<8x8xf32> to vector<8x8x1xf32>
    %104 = vector.shape_cast %67 : vector<16x32xf32> to vector<16x8x4xf32>
    %105 = tpu.transpose %104, [1, 0, 2] : vector<16x8x4xf32> -> vector<8x16x4xf32>
    %cst_54 = arith.constant dense<0.000000e+00> : vector<8x8x4xf32>
    %106 = tpu.matmul %101, %105, %cst_54 {dimension_numbers = #tpu.dot_dimension_numbers<[2], [1], [1], [2], [0, 0, 0, 1, 1, 2], [0], [0]>} : vector<8x8x16xf32>, vector<8x16x4xf32>, vector<8x8x4xf32> -> vector<8x8x4xf32>
    %107 = tpu.reciprocal %103 : vector<8x8x1xf32> -> vector<8x8x1xf32>
    %108 = vector.broadcast %107 : vector<8x8x1xf32> to vector<8x8x4xf32>
    %109 = arith.mulf %106, %108 : vector<8x8x4xf32>
    %110 = tpu.transpose %109, [1, 0, 2] : vector<8x8x4xf32> -> vector<8x8x4xf32>
    %111 = vector.shape_cast %110 : vector<8x8x4xf32> to vector<8x32xf32>
    %c0_55 = arith.constant 0 : index
    %c0_56 = arith.constant 0 : index
    %112 = vector.load %arg17[%c0_55, %c0_56] : memref<32x32xf32, #tpu.memory_space<vmem>>, vector<32x32xf32>
    %cst_57 = arith.constant dense<0.000000e+00> : vector<8x32xf32>
    %113 = tpu.matmul %111, %112, %cst_57 {dimension_numbers = #tpu.dot_dimension_numbers<[1], [0], [0], [1], [0, 0, 1, 1], [], []>} : vector<8x32xf32>, vector<32x32xf32>, vector<8x32xf32> -> vector<8x32xf32>
    %c0_58 = arith.constant 0 : index
    %c0_59 = arith.constant 0 : index
    %114 = vector.load %arg18[%c0_58, %c0_59] : memref<1x32xf32, #tpu.memory_space<vmem>>, vector<1x32xf32>
    %115 = vector.broadcast %114 : vector<1x32xf32> to vector<8x32xf32>
    %116 = arith.addf %113, %115 : vector<8x32xf32>
    %c0_60 = arith.constant 0 : index
    %c0_61 = arith.constant 0 : index
    %c0_62 = arith.constant 0 : index
    %117 = vector.load %arg19[%c0_60, %c0_61, %c0_62] : memref<1x8x32xf32, #tpu.memory_space<vmem>>, vector<1x8x32xf32>
    %118 = vector.shape_cast %117 : vector<1x8x32xf32> to vector<8x32xf32>
    %119 = vector.shape_cast %116 : vector<8x32xf32> to vector<1x8x32xf32>
    tpu.vector_store %arg19[%c0_60, %c0_61, %c0_62], %119 {strides = array<i32>} : memref<1x8x32xf32, #tpu.memory_space<vmem>>, vector<1x8x32xf32>,
    return
  }
  func.func @transform_0(%arg0: i32, %arg1: i32) -> (i32, i32, i32) {
    %c0_i32 = arith.constant 0 : i32
    %c0_i32_0 = arith.constant 0 : i32
    %c0_i32_1 = arith.constant 0 : i32
    return %arg0, %c0_i32, %c0_i32_0 : i32, i32, i32
  }
  func.func @transform_1(%arg0: i32, %arg1: i32) -> (i32, i32, i32, i32) {
    %c0_i32 = arith.constant 0 : i32
    %c0_i32_0 = arith.constant 0 : i32
    %c0_i32_1 = arith.constant 0 : i32
    return %arg0, %arg1, %c0_i32, %c0_i32_0 : i32, i32, i32, i32
  }
  func.func @transform_2(%arg0: i32, %arg1: i32) -> (i32, i32, i32, i32) {
    %c0_i32 = arith.constant 0 : i32
    %c0_i32_0 = arith.constant 0 : i32
    %c0_i32_1 = arith.constant 0 : i32
    return %arg0, %arg1, %c0_i32, %c0_i32_0 : i32, i32, i32, i32
  }
  func.func @transform_3(%arg0: i32, %arg1: i32) -> (i32, i32, i32) {
    %c0_i32 = arith.constant 0 : i32
    %c0_i32_0 = arith.constant 0 : i32
    %c0_i32_1 = arith.constant 0 : i32
    return %arg0, %c0_i32, %c0_i32_0 : i32, i32, i32
  }
  func.func @transform_4(%arg0: i32, %arg1: i32) -> (i32, i32) {
    %c0_i32 = arith.constant 0 : i32
    %c0_i32_0 = arith.constant 0 : i32
    %c0_i32_1 = arith.constant 0 : i32
    return %c0_i32, %c0_i32_0 : i32, i32
  }
  func.func @transform_5(%arg0: i32, %arg1: i32) -> (i32, i32) {
    %c0_i32 = arith.constant 0 : i32
    %c0_i32_0 = arith.constant 0 : i32
    %c0_i32_1 = arith.constant 0 : i32
    return %c0_i32, %c0_i32_0 : i32, i32
  }
  func.func @transform_6(%arg0: i32, %arg1: i32) -> (i32, i32) {
    %c0_i32 = arith.constant 0 : i32
    %c0_i32_0 = arith.constant 0 : i32
    %c0_i32_1 = arith.constant 0 : i32
    return %c0_i32, %c0_i32_0 : i32, i32
  }
  func.func @transform_7(%arg0: i32, %arg1: i32) -> (i32, i32) {
    %c0_i32 = arith.constant 0 : i32
    %c0_i32_0 = arith.constant 0 : i32
    %c0_i32_1 = arith.constant 0 : i32
    return %c0_i32, %c0_i32_0 : i32, i32
  }
  func.func @transform_8(%arg0: i32, %arg1: i32) -> (i32, i32) {
    %c0_i32 = arith.constant 0 : i32
    %c0_i32_0 = arith.constant 0 : i32
    %c0_i32_1 = arith.constant 0 : i32
    return %c0_i32, %c0_i32_0 : i32, i32
  }
  func.func @transform_9(%arg0: i32, %arg1: i32) -> (i32, i32) {
    %c0_i32 = arith.constant 0 : i32
    %c0_i32_0 = arith.constant 0 : i32
    %c0_i32_1 = arith.constant 0 : i32
    return %c0_i32, %c0_i32_0 : i32, i32
  }
  func.func @transform_10(%arg0: i32, %arg1: i32) -> (i32, i32) {
    %c0_i32 = arith.constant 0 : i32
    %c0_i32_0 = arith.constant 0 : i32
    %c0_i32_1 = arith.constant 0 : i32
    return %c0_i32, %c0_i32_0 : i32, i32
  }
  func.func @transform_11(%arg0: i32, %arg1: i32) -> (i32, i32) {
    %c0_i32 = arith.constant 0 : i32
    %c0_i32_0 = arith.constant 0 : i32
    %c0_i32_1 = arith.constant 0 : i32
    return %c0_i32, %c0_i32_0 : i32, i32
  }
  func.func @transform_12(%arg0: i32, %arg1: i32) -> (i32, i32) {
    %c0_i32 = arith.constant 0 : i32
    %c0_i32_0 = arith.constant 0 : i32
    %c0_i32_1 = arith.constant 0 : i32
    return %c0_i32, %c0_i32_0 : i32, i32
  }
  func.func @transform_13(%arg0: i32, %arg1: i32) -> (i32, i32) {
    %c0_i32 = arith.constant 0 : i32
    %c0_i32_0 = arith.constant 0 : i32
    %c0_i32_1 = arith.constant 0 : i32
    return %c0_i32, %c0_i32_0 : i32, i32
  }
  func.func @transform_14(%arg0: i32, %arg1: i32) -> (i32, i32) {
    %c0_i32 = arith.constant 0 : i32
    %c0_i32_0 = arith.constant 0 : i32
    %c0_i32_1 = arith.constant 0 : i32
    return %c0_i32, %c0_i32_0 : i32, i32
  }
  func.func @transform_15(%arg0: i32, %arg1: i32) -> (i32, i32) {
    %c0_i32 = arith.constant 0 : i32
    %c0_i32_0 = arith.constant 0 : i32
    %c0_i32_1 = arith.constant 0 : i32
    return %c0_i32, %c0_i32_0 : i32, i32
  }
  func.func @transform_16(%arg0: i32, %arg1: i32) -> (i32, i32) {
    %c0_i32 = arith.constant 0 : i32
    %c0_i32_0 = arith.constant 0 : i32
    %c0_i32_1 = arith.constant 0 : i32
    return %c0_i32, %c0_i32_0 : i32, i32
  }
  func.func @transform_17(%arg0: i32, %arg1: i32) -> (i32, i32, i32) {
    %c0_i32 = arith.constant 0 : i32
    %c0_i32_0 = arith.constant 0 : i32
    return %arg0, %arg1, %c0_i32 : i32, i32, i32
  }
}

</mosaic_0001>

<bundles_post_ra>
// kernel: tpu_custom_call.1
= control target key start
LH: loop header
LB: loop body
LE: loop exit
PB: predicated region body
PF: predicated region fallthrough
CT: control target
= control target key end

     0   :  { %s6752_s0 = inlined_call_operand.hbm [shape: f32[2,16,32], index: 0, kind: input, shape index: {}]   ;;  %s6753_s1 = inlined_call_operand.hbm [shape: bf16[2,16,16,8], index: 1, kind: input, shape index: {}]   ;;  %s6754_s2 = inlined_call_operand.hbm [shape: bf16[2,16,16,8], index: 2, kind: input, shape index: {}]   ;;  %s6755_s3 = inlined_call_operand.hbm [shape: f32[2,1,16], index: 3, kind: input, shape index: {}]   ;;  %s6756_s4 = inlined_call_operand.hbm [shape: f32[1,32], index: 4, kind: input, shape index: {}]   ;;  %s6757_s5 = inlined_call_operand.hbm [shape: f32[1,32], index: 5, kind: input, shape index: {}]   ;;  %s6758_s6 = inlined_call_operand.hbm [shape: f32[32,8], index: 6, kind: input, shape index: {}]   ;;  %s6759_s7 = inlined_call_operand.hbm [shape: f32[1,8], index: 7, kind: input, shape index: {}]   ;;  %s6760_s8 = inlined_call_operand.hbm [shape: f32[32,8], index: 8, kind: input, shape index: {}]   ;;  %s6761_s9 = inlined_call_operand.hbm [shape: f32[1,8], index: 9, kind: input, shape index: {}]   ;;  %s6762_s10 = inlined_call_operand.hbm [shape: f32[32,32], index: 10, kind: input, shape index: {}]   ;;  %s6763_s11 = inlined_call_operand.hbm [shape: f32[1,32], index: 11, kind: input, shape index: {}]   ;;  %s6764_s12 = inlined_call_operand.hbm [shape: f32[8,8], index: 12, kind: input, shape index: {}]   ;;  %s6765_s13 = inlined_call_operand.hbm [shape: f32[8,8], index: 13, kind: input, shape index: {}]   ;;  %s6766_s14 = inlined_call_operand.hbm [shape: f32[8,8], index: 14, kind: input, shape index: {}]   ;;  %s6767_s15 = inlined_call_operand.hbm [shape: f32[32,32], index: 15, kind: input, shape index: {}]   ;;  %s6768_s16 = inlined_call_operand.hbm [shape: f32[1,32], index: 16, kind: input, shape index: {}]   ;;  %s6769_s17 = inlined_call_operand.hbm [shape: f32[2,16,32], index: 17, kind: output, shape index: {}]  }
   0x1   :  { %6815 = sst [smem:[#allocation56_spill]] %s6752_s0 }
   0x2   :  { %6816 = sst [smem:[#allocation57_spill]] %s6753_s1 }
   0x3   :  { %6817 = sst [smem:[#allocation58_spill]] %s6755_s3 }
   0x4   :  { %6818 = sst [smem:[#allocation59_spill]] %s6756_s4 }
   0x5   :  { %6819 = sst [smem:[#allocation60_spill]] %s6757_s5 }
   0x6   :  { %6820 = sst [smem:[#allocation61_spill]] %s6759_s7 }
   0x7   :  { %6821 = sst [smem:[#allocation62_spill]] %s6761_s9 }
   0x8   :  { %6822 = sst [smem:[#allocation63_spill]] %s6762_s10 }
   0x9   :  { %6823 = sst [smem:[#allocation64_spill]] %s6763_s11 }
   0xa   :  { %6824 = sst [smem:[#allocation65_spill]] %s6764_s12 }
   0xb   :  { %6825 = sst [smem:[#allocation66_spill]] %s6765_s13 }
   0xc   :  { %6826 = sst [smem:[#allocation67_spill]] %s6766_s14 }
   0xd   :  { %6827 = sst [smem:[#allocation68_spill]] %s6767_s15 }
   0xe   :  { %6828 = sst [smem:[#allocation69_spill]] %s6768_s16 }
   0xf   :  { %6829 = sst [smem:[#allocation70_spill]] %s6769_s17 }
  0x10   :  { %22 = vsyncpa [#allocation3], 0 }
  0x11   :  { %24 = vsyncpa [#allocation3 + $0x1], 0 }
  0x12   :  { %25 = vsyncpa [#allocation6], 0 }
  0x13   :  { %27 = vsyncpa [#allocation6 + $0x1], 0 }
  0x14   :  { %28 = vsyncpa [#allocation9], 0 }
  0x15   :  { %30 = vsyncpa [#allocation9 + $0x1], 0 }
  0x16   :  { %31 = vsyncpa [#allocation12], 0 }
  0x17   :  { %32 = vsyncpa [#allocation15], 0 }
  0x18   :  { %33 = vsyncpa [#allocation18], 0 }
  0x19   :  { %34 = vsyncpa [#allocation21], 0 }
  0x1a   :  { %35 = vsyncpa [#allocation24], 0 }
  0x1b   :  { %36 = vsyncpa [#allocation27], 0 }
  0x1c   :  { %37 = vsyncpa [#allocation4], 0 }
  0x1d   :  { %39 = vsyncpa [#allocation4 + $0x1], 0  ;;  %s5598_s24 = smov 0   ;;  %s5600_s25 = smov 0  }
  0x1e   :  { %s5602_s26 = smov 0   ;;  %s5604_s27 = smov 0  }
  0x1f   :  { %s5606_s28 = smov 0   ;;  %s5608_s29 = smov 0  }
  0x20   :  { %s5610_s0 = smov 0   ;;  %s5612_s30 = smov 0  }
  0x21   :  { %s5614_s18 = smov 0   ;;  %s5616_s19 = smov 0  }
  0x22   :  { %s5618_s1 = smov 0  }
  0x23 LB: > { %6830 = sst [smem:[#allocation41_spill]] %s5419_s24  ;;  %s5654_s20 = sadd.s32 4294967295, %s5459_s1   ;;  %s5459_s1 = sphi %s5618_s1, %s45_s1   ;;  %s5455_s19 = sphi %s5616_s19, %s6933_s19   ;;  %s5451_s18 = sphi %s5614_s18, %s6926_s18   ;;  %s5447_s30 = sphi %s5612_s30, %s6932_s30   ;;  %s5443_s0 = sphi %s5610_s0, %s6931_s0   ;;  %s5439_s29 = sphi %s5608_s29, %s6930_s29   ;;  %s5435_s28 = sphi %s5606_s28, %s6924_s28   ;;  %s5431_s27 = sphi %s5604_s27, %s6923_s27   ;;  %s5427_s26 = sphi %s5602_s26, %s6922_s26   ;;  %s5423_s25 = sphi %s5600_s25, %s6929_s25   ;;  %s5419_s24 = sphi %s5598_s24, %s6928_s24  }
  0x24   : > { %6831 = sst [smem:[#allocation42_spill]] %s5427_s26  ;;  %p3879_p0 = scmp.ge.s32.totalorder %s5459_s1, 1 }
  0x25   : > { %6832 = sst [smem:[#allocation43_spill]] %s5431_s27  ;;  %p6780_p1 = scmp.eq.s32.totalorder %s5654_s20, 0 }
  0x26   : > { %6833 = sst [smem:[#allocation44_spill]] %s5435_s28  ;;  %p471_p2 = scmp.lt.s32.totalorder %s5459_s1, 5 }
  0x27   : > { %6834 = sst [smem:[#allocation45_spill]] %s5439_s29  ;;  %s5461_s22 = smov [#allocation10]  }
  0x28   : > { %6835 = sst [smem:[#allocation46_spill]] %s5443_s0  ;;  %p5659_p3 = pnand %p3879_p0, %p471_p2 }
  0x29   : > { %6836 = sst [smem:[#allocation47_spill]] %s5447_s30  ;;  %s484_s23 = sshll.u32 %s5461_s22, 4  ;;  %s485_s23 = int_to_ptr.vmem [resolvable:$true] %s484_s23 }
  0x2a   : > { %6837 = sst [smem:[#allocation48_spill]] %s5451_s18  ;;  %p4563_p4 = pneg %p5659_p3 }
  0x2b   : > { %s6838_s21 = scalar_select %p5659_p3, 1, 0 }
  0x2c   : > { %s5462_s17 = smov [#allocation11]   ;;  %p5667_p5 = pnand %p4563_p4, %p6780_p1 }
  0x2d   : > { %6839 = sst [smem:[#allocation49_spill]] %s6838_s21  ;;  %s495_s30 = sshll.u32 %s5462_s17, 4  ;;  %s5671_s30 = int_to_ptr.vmem [resolvable:$true] %s495_s30 }
  0x2e   : > { %s6840_s0 = scalar_select %p5667_p5, 1, 0 }
  0x2f   : > { %s5463_s3 = smov [#allocation14]   ;;  %s6841_s4 = sld [smem:[#allocation59_spill]] }
  0x30   : > { %s519_s27 = sshll.u32 %s5463_s3, 4  ;;  %p5683_p7 = pneg %p5667_p5  ;;  %s5673_s27 = int_to_ptr.vmem [resolvable:$true] %s519_s27 }
  0x35   : > { %s4817_s22 = scalar_lea.hbm %s6841_s4, 16 }
  0x36   : > { %p4818_p6 = scmp.ne.s32.totalorder %s6841_s4, %s4817_s22  ;;  %p4824_p10 = scmp.lt.u32.totalorder %s4817_s22, %s6841_s4 }
  0x38   : > { %p4820_p8 = pnand %p5683_p7, %p4818_p6 }
  0x3a   : > { %p4821_p9 = pneg %p4820_p8 }
  0x3c   : > { %p4826_p11 = pnand %p4824_p10, %p4821_p9 }
  0x3e   : > { %4829 = shalt.err (!%p4826_p11)
}
  0x3f   : > { %s4830_s28 = scalar_lea.vmem %s485_s23, 16  ;;  %s4837_s16 = scalar_lea.vmem %s485_s23, 32 }
  0x40   : > { %p4831_p12 = scmp.ne.s32.totalorder %s485_s23, %s4830_s28  ;;  %p4838_p2 = scmp.lt.s32.totalorder %s485_s23, %s485_s23 }
  0x41   : > { %p4839_p4 = scmp.lt.s32.totalorder %s4837_s16, %s4830_s28 }
  0x42   : > { %p4833_p13 = pnand %p4831_p12, %p5683_p7 }
  0x43   : > { %p4840_p1 = por %p4839_p4, %p4838_p2 }
  0x44   : > { %p4834_p0 = pneg %p4833_p13 }
  0x46   : > { %p4841_p3 = pnand %p4840_p1, %p4834_p0 }
  0x48   : > { %4844 = shalt.err (!%p4841_p3)
}
  0x49   : > { %4566 = dma.hbm_to_vmem [thread:$0]  (!%p5667_p5), %s6841_s4, 16, %s485_s23, [#allocation9]  }
  0x4a   : > { %s6843_s5 = sld [smem:[#allocation60_spill]] }
  0x50   : > { %s4845_s3 = scalar_lea.hbm %s6843_s5, 16 }
  0x51   : > { %p4846_p6 = scmp.ne.s32.totalorder %s6843_s5, %s4845_s3  ;;  %p4852_p1 = scmp.lt.u32.totalorder %s4845_s3, %s6843_s5 }
  0x53   : > { %p4848_p8 = pnand %p4846_p6, %p5683_p7 }
  0x55   : > { %p4849_p9 = pneg %p4848_p8 }
  0x57   : > { %p4854_p3 = pnand %p4852_p1, %p4849_p9 }
  0x59   : > { %4857 = shalt.err (!%p4854_p3)
}
  0x5a   : > { %s4858_s23 = scalar_lea.vmem %s5671_s30, 16  ;;  %s4865_s10 = scalar_lea.vmem %s5671_s30, 32 }
  0x5b   : > { %p4859_p10 = scmp.ne.s32.totalorder %s5671_s30, %s4858_s23  ;;  %p4866_p13 = scmp.lt.s32.totalorder %s5671_s30, %s5671_s30 }
  0x5c   : > { %p4867_p0 = scmp.lt.s32.totalorder %s4865_s10, %s4858_s23 }
  0x5d   : > { %p4861_p11 = pnand %p4859_p10, %p5683_p7 }
  0x5e   : > { %p4868_p2 = por %p4867_p0, %p4866_p13 }
  0x5f   : > { %p4862_p12 = pneg %p4861_p11 }
  0x61   : > { %p4869_p4 = pnand %p4868_p2, %p4862_p12 }
  0x63   : > { %4872 = shalt.err (!%p4869_p4)
}
  0x64   : > { %4569 = dma.hbm_to_vmem [thread:$0]  (!%p5667_p5), %s6843_s5, 16, %s5671_s30, [#allocation12]  }
  0x65   : > { %s6844_s7 = sld [smem:[#allocation61_spill]] }
  0x6b   : > { %s4873_s22 = scalar_lea.hbm %s6844_s7, 16 }
  0x6c   : > { %p4874_p6 = scmp.ne.s32.totalorder %s6844_s7, %s4873_s22  ;;  %p4880_p1 = scmp.lt.u32.totalorder %s4873_s22, %s6844_s7 }
  0x6e   : > { %p4876_p8 = pnand %p4874_p6, %p5683_p7 }
  0x70   : > { %p4877_p9 = pneg %p4876_p8 }
  0x72   : > { %p4882_p3 = pnand %p4880_p1, %p4877_p9 }
  0x74   : > { %4885 = shalt.err (!%p4882_p3)
}
  0x75   : > { %s4886_s30 = scalar_lea.vmem %s5673_s27, 16  ;;  %s4893_s10 = scalar_lea.vmem %s5673_s27, 32 }
  0x76   : > { %p4887_p10 = scmp.ne.s32.totalorder %s5673_s27, %s4886_s30  ;;  %p4894_p13 = scmp.lt.s32.totalorder %s5673_s27, %s5673_s27 }
  0x77   : > { %p4895_p0 = scmp.lt.s32.totalorder %s4893_s10, %s4886_s30 }
  0x78   : > { %p4889_p11 = pnand %p4887_p10, %p5683_p7 }
  0x79   : > { %p4896_p2 = por %p4895_p0, %p4894_p13 }
  0x7a   : > { %p4890_p12 = pneg %p4889_p11 }
  0x7c   : > { %p4897_p4 = pnand %p4896_p2, %p4890_p12 }
  0x7e   : > { %4900 = shalt.err (!%p4897_p4)
}
  0x7f   : > { %4575 = dma.hbm_to_vmem [thread:$0]  (!%p5667_p5), %s6844_s7, 16, %s5673_s27, [#allocation15]  }
  0x80   : > { %s5464_s21 = smov [#allocation17]   ;;  %s5465_s22 = smov [#allocation20]  }
  0x81   : > { %s543_s14 = sshll.u32 %s5464_s21, 4  ;;  %s567_s3 = sshll.u32 %s5465_s22, 4  ;;  %s544_s14 = int_to_ptr.vmem [resolvable:$true] %s543_s14  ;;  %s568_s3 = int_to_ptr.vmem [resolvable:$true] %s567_s3 }
  0x82   : > { %s6845_s9 = sld [smem:[#allocation62_spill]] }
  0x88   : > { %s4901_s23 = scalar_lea.hbm %s6845_s9, 16 }
  0x89   : > { %p4902_p6 = scmp.ne.s32.totalorder %s6845_s9, %s4901_s23  ;;  %p4908_p1 = scmp.lt.u32.totalorder %s4901_s23, %s6845_s9 }
  0x8b   : > { %p4904_p8 = pnand %p4902_p6, %p5683_p7 }
  0x8d   : > { %p4905_p9 = pneg %p4904_p8 }
  0x8f   : > { %p4910_p3 = pnand %p4908_p1, %p4905_p9 }
  0x91   : > { %4913 = shalt.err (!%p4910_p3)
}
  0x92   : > { %s4914_s27 = scalar_lea.vmem %s544_s14, 16  ;;  %s4921_s29 = scalar_lea.vmem %s544_s14, 32 }
  0x93   : > { %p4915_p10 = scmp.ne.s32.totalorder %s544_s14, %s4914_s27  ;;  %p4922_p13 = scmp.lt.s32.totalorder %s544_s14, %s544_s14 }
  0x94   : > { %p4923_p0 = scmp.lt.s32.totalorder %s4921_s29, %s4914_s27 }
  0x95   : > { %p4917_p11 = pnand %p4915_p10, %p5683_p7 }
  0x96   : > { %p4924_p2 = por %p4923_p0, %p4922_p13 }
  0x97   : > { %p4918_p12 = pneg %p4917_p11 }
  0x99   : > { %p4925_p4 = pnand %p4924_p2, %p4918_p12 }
  0x9b   : > { %4928 = shalt.err (!%p4925_p4)
}
  0x9c   : > { %4581 = dma.hbm_to_vmem [thread:$0]  (!%p5667_p5), %s6845_s9, 16, %s544_s14, [#allocation18]  }
  0x9d   : > { %s6846_s11 = sld [smem:[#allocation64_spill]] }
  0xa3   : > { %s4929_s16 = scalar_lea.hbm %s6846_s11, 16 }
  0xa4   : > { %p4930_p6 = scmp.ne.s32.totalorder %s6846_s11, %s4929_s16  ;;  %p4936_p1 = scmp.lt.u32.totalorder %s4929_s16, %s6846_s11 }
  0xa6   : > { %p4932_p8 = pnand %p4930_p6, %p5683_p7 }
  0xa8   : > { %p4933_p9 = pneg %p4932_p8 }
  0xaa   : > { %p4938_p3 = pnand %p4936_p1, %p4933_p9 }
  0xac   : > { %4941 = shalt.err (!%p4938_p3)
}
  0xad   : > { %s4942_s27 = scalar_lea.vmem %s568_s3, 16  ;;  %s4949_s14 = scalar_lea.vmem %s568_s3, 32 }
  0xae   : > { %p4943_p10 = scmp.ne.s32.totalorder %s568_s3, %s4942_s27  ;;  %p4950_p13 = scmp.lt.s32.totalorder %s568_s3, %s568_s3 }
  0xaf   : > { %p4951_p0 = scmp.lt.s32.totalorder %s4949_s14, %s4942_s27 }
  0xb0   : > { %p4945_p11 = pnand %p4943_p10, %p5683_p7 }
  0xb1   : > { %p4952_p2 = por %p4951_p0, %p4950_p13 }
  0xb2   : > { %p4946_p12 = pneg %p4945_p11 }
  0xb4   : > { %p4953_p4 = pnand %p4952_p2, %p4946_p12 }
  0xb6   : > { %4956 = shalt.err (!%p4953_p4)
}
  0xb7   : > { %4587 = dma.hbm_to_vmem [thread:$0]  (!%p5667_p5), %s6846_s11, 16, %s568_s3, [#allocation21]  }
  0xb8   : > { %s5466_s22 = smov [#allocation23]   ;;  %s6847_s13 = sld [smem:[#allocation66_spill]] }
  0xb9   : > { %s589_s4 = sshll.u32 %s5466_s22, 4  ;;  %s590_s4 = int_to_ptr.vmem [resolvable:$true] %s589_s4 }
  0xbe   : > { %s4957_s23 = scalar_lea.hbm %s6847_s13, 128 }
  0xbf   : > { %p4958_p6 = scmp.ne.s32.totalorder %s6847_s13, %s4957_s23  ;;  %p4964_p1 = scmp.lt.u32.totalorder %s4957_s23, %s6847_s13 }
  0xc1   : > { %p4960_p8 = pnand %p4958_p6, %p5683_p7 }
  0xc3   : > { %p4961_p9 = pneg %p4960_p8 }
  0xc5   : > { %p4966_p3 = pnand %p4964_p1, %p4961_p9 }
  0xc7   : > { %4969 = shalt.err (!%p4966_p3)
}
  0xc8   : > { %s4970_s3 = scalar_lea.vmem %s590_s4, 128  ;;  %p4978_p13 = scmp.lt.s32.totalorder %s590_s4, %s590_s4 }
  0xc9   : > { %p4971_p10 = scmp.ne.s32.totalorder %s590_s4, %s4970_s3  ;;  %p4979_p0 = scmp.lt.s32.totalorder %s4970_s3, %s4970_s3 }
  0xcb   : > { %p4973_p11 = pnand %p4971_p10, %p5683_p7  ;;  %p4980_p2 = por %p4979_p0, %p4978_p13 }
  0xcd   : > { %p4974_p12 = pneg %p4973_p11 }
  0xcf   : > { %p4981_p4 = pnand %p4980_p2, %p4974_p12 }
  0xd1   : > { %4984 = shalt.err (!%p4981_p4)
}
  0xd2   : > { %4593 = dma.hbm_to_vmem [thread:$0]  (!%p5667_p5), %s6847_s13, 128, %s590_s4, [#allocation24]  }
  0xd3   : > { %s5467_s21 = smov [#allocation26]   ;;  %s6848_s15 = sld [smem:[#allocation68_spill]] }
  0xd4   : > { %s610_s22 = sshll.u32 %s5467_s21, 4  ;;  %s611_s22 = int_to_ptr.vmem [resolvable:$true] %s610_s22 }
  0xd9   : > { %s4985_s23 = scalar_lea.hbm %s6848_s15, 512 }
  0xda   : > { %p4986_p6 = scmp.ne.s32.totalorder %s6848_s15, %s4985_s23  ;;  %p4992_p1 = scmp.lt.u32.totalorder %s4985_s23, %s6848_s15 }
  0xdc   : > { %p4988_p8 = pnand %p4986_p6, %p5683_p7 }
  0xde   : > { %p4989_p9 = pneg %p4988_p8 }
  0xe0   : > { %p4994_p3 = pnand %p4992_p1, %p4989_p9 }
  0xe2   : > { %4997 = shalt.err (!%p4994_p3)
}
  0xe3   : > { %s4998_s4 = scalar_lea.vmem %s611_s22, 512  ;;  %p5006_p13 = scmp.lt.s32.totalorder %s611_s22, %s611_s22 }
  0xe4   : > { %p4999_p10 = scmp.ne.s32.totalorder %s611_s22, %s4998_s4  ;;  %p5007_p0 = scmp.lt.s32.totalorder %s4998_s4, %s4998_s4 }
  0xe6   : > { %p5001_p11 = pnand %p4999_p10, %p5683_p7  ;;  %p5008_p2 = por %p5007_p0, %p5006_p13 }
  0xe8   : > { %p5002_p12 = pneg %p5001_p11 }
  0xea   : > { %p5009_p4 = pnand %p5008_p2, %p5002_p12 }
  0xec   : > { %5012 = shalt.err (!%p5009_p4)
}
  0xed   : > { %s6784_s3 = smov 128   ;;  %s6786_s14 = smov 8  }
  0xee   : > { %4599 = dma.hbm_to_vmem [thread:$0]  (!%p5667_p5), %s6848_s15, 512, %s611_s22, [#allocation27], %s6784_s3, %s6784_s3, %s6786_s14  }
  0xef   : > { %s3878_s28 = sadd.s32 4294967294, %s5459_s1   ;;  %s54_s16 = sadd.s32 1, %s5451_s18 }
  0xf0   : > { %s57_s23 = sadd.s32 1, %s5455_s19  ;;  %p55_p6 = scmp.ge.s32.totalorder %s54_s16, 2 }
  0xf1   : > { %p6792_p8 = scmp.eq.s32.totalorder %s5459_s1, 0  ;;  %s92_s30 = sadd.s32 1, %s5427_s26 }
  0xf2   : > { %p99_p9 = scmp.ne.s32.totalorder %s5427_s26, %s5423_s25  ;;  %s6935_s16 = smov (%p55_p6, %s54_s16), 0 }
  0xf3   : > { %6849 = sst [smem:[#allocation50_spill]] %s6935_s16  ;;  %s6937_s23 = smov (!%p55_p6, %s57_s23), %s5455_s19 }
  0xf4   : > { %s88_s10 = ssub.s32 %s5451_s18, %s6935_s16  ;;  %p5836_p1 = por %p99_p9, %p6792_p8 }
  0xf5   : > { %p59_p3 = scmp.ge.s32.totalorder %s6937_s23, 2  ;;  %p105_p10 = scmp.ne.s32.totalorder %s5423_s25, %s5419_s24 }
  0xf6   : > { %p458_p11 = scmp.eq.s32.totalorder %s5654_s20, 3  ;;  %p464_p12 = scmp.eq.s32.totalorder %s3878_s28, 3 }
  0xf7   : > { %s6939_s23 = smov (%p59_p3, %s6937_s23), 0  ;;  %p6852_p13 = scmp.eq.s32.totalorder %s5654_s20, 0 }
  0xf8   : > { %6851 = sst [smem:[#allocation51_spill]] %s6939_s23  ;;  %p5851_p2 = por %p458_p11, %p99_p9 }
  0xf9   : > { %p5847_p0 = por %p105_p10, %p6852_p13  ;;  %s5857_s4 = ssub.s32 %s5455_s19, %s6939_s23 }
  0xfa   : > { %s6855_s27 = scalar_select %p5851_p2, 1, 0 }
  0xfb   : > { %s6853_s12 = scalar_select %p5847_p0, 1, 0 }
  0xfc   : > { %6856 = sst [smem:[#allocation53_spill]] %s6855_s27  ;;  %p5859_p4 = por %p464_p12, %p105_p10 }
  0xfd   : > { %6854 = sst [smem:[#allocation52_spill]] %s6853_s12  ;;  %s89_s21 = sor.u32 %s88_s10, %s5857_s4 }
  0xfe   : > { %s6857_s29 = scalar_select %p5859_p4, 1, 0 }
  0xff   : > { %p90_p3 = scmp.eq.s32.totalorder %s89_s21, 0  ;;  %p6791_p13 = scmp.lt.s32.totalorder %s5459_s1, 4 }
 0x100   : > { %6858 = sst [smem:[#allocation54_spill]] %s6857_s29  ;;  %s658_s3 = sand.u32 1, %s5427_s26  }
 0x101   : > { %s5869_s14 = scalar_select %p90_p3, %s5427_s26, %s92_s30  }
 0x102   : > { %s5871_s5 = sshll.u32 %s658_s3, 6  ;;  %s4022_s7 = sshll.u32 %s5451_s18, 4 }
 0x103   : > { %6859 = sst [smem:[#allocation55_spill]] %s5869_s14  ;;  %s3900_s9 = sshll.u32 %s5455_s19, 5 }
 0x104   : > { %s660_s11 = scalar_lea.vmem [#allocation5], %s5871_s5  ;;  %s5876_s15 = sadd.s32 %s4022_s7, %s3900_s9 }
 0x105   : > { %s670_s13 = sshll.u32 %s660_s11, 4  ;;  %s6789_s10 = sshll.u32 %s5876_s15, 6  ;;  %s5878_s13 = int_to_ptr.vmem [resolvable:$true] %s670_s13 }
 0x106   : > { %p5885_p9 = pnand %p6791_p13, %p5836_p1  ;;  %s6861_s28 = sld [smem:[#allocation57_spill]] }
 0x107   : > { %s6863_s7 = sand.u32 1, %s5459_s1  }
 0x108   : > { %s6860_s21 = scalar_select %p5885_p9, 1, 0 }
 0x109   : > { %s5898_s9 = scalar_lea.sflag [#allocation6], %s6863_s7  ;;  %p6806_p10 = pneg %p5885_p9 }
 0x10c   : > { %s6862_s23 = smov %s6861_s28  ;;  %s5894_s11 = scalar_lea.hbm %s6861_s28, %s6789_s10 }
 0x10d   : > { %s5013_s22 = scalar_lea.hbm %s5894_s11, 1024  ;;  %s5018_s28 = scalar_lea.hbm %s6862_s23, 4096 }
 0x10e   : > { %p5014_p1 = scmp.ne.s32.totalorder %s5894_s11, %s5013_s22  ;;  %p5019_p3 = scmp.lt.u32.totalorder %s5894_s11, %s6862_s23 }
 0x10f   : > { %p5020_p13 = scmp.lt.u32.totalorder %s5018_s28, %s5013_s22  ;;  %p5022_p6 = scmp.lt.u32.totalorder %s5013_s22, %s5894_s11 }
 0x110   : > { %p5016_p11 = pnand %p6806_p10, %p5014_p1 }
 0x111   : > { %p5021_p8 = por %p5020_p13, %p5019_p3 }
 0x112   : > { %p5017_p12 = pneg %p5016_p11 }
 0x113   : > { %p5023_p4 = por %p5022_p6, %p5021_p8 }
 0x115   : > { %p5024_p2 = pnand %p5023_p4, %p5017_p12 }
 0x117   : > { %5027 = shalt.err (!%p5024_p2)
}
 0x118   : > { %s5028_s7 = scalar_lea.vmem %s5878_s13, 1024  ;;  %s5470_s3 = smov [#allocation5]  }
 0x119   : > { %p5029_p1 = scmp.ne.s32.totalorder %s5878_s13, %s5028_s7  ;;  %s5033_s30 = sshll.u32 %s5470_s3, 4  ;;  %s5034_s30 = int_to_ptr.vmem [resolvable:$false] %s5033_s30 }
 0x11a   : > { %s5035_s16 = scalar_lea.vmem %s5034_s30, 2048  ;;  %p5036_p5 = scmp.lt.s32.totalorder %s5878_s13, %s5034_s30 }
 0x11b   : > { %p5031_p11 = pnand %p5029_p1, %p6806_p10  ;;  %p5037_p13 = scmp.lt.s32.totalorder %s5035_s16, %s5028_s7 }
 0x11d   : > { %p5032_p0 = pneg %p5031_p11  ;;  %p5038_p3 = por %p5037_p13, %p5036_p5 }
 0x11f   : > { %p5039_p8 = pnand %p5038_p3, %p5032_p0 }
 0x121   : > { %5042 = shalt.err (!%p5039_p8)
}
 0x122   : > { %s6809_s10 = smov 64   ;;  %s6810_s22 = smov 4  }
 0x123   : > { %4609 = dma.hbm_to_vmem [thread:$0]  (!%p5885_p9), %s5894_s11, 1024, %s5878_s13, %s5898_s9, %s6809_s10, %s6809_s10, %s6810_s22  }
 0x124   : > { %s6864_s28 = sshll.u32 %s5876_s15, 6  ;;  %s684_s16 = scalar_lea.vmem [#allocation7], %s5871_s5 }
 0x125   : > { %s5934_s30 = scalar_lea.hbm %s6754_s2, %s6864_s28  ;;  %s694_s23 = sshll.u32 %s684_s16, 4  ;;  %s5937_s23 = int_to_ptr.vmem [resolvable:$true] %s694_s23 }
 0x126   : > { %s5473_s18 = smov [#allocation13]   ;;  %s5043_s24 = scalar_lea.hbm %s6758_s6, 512 }
 0x127   : > { %s505_s14 = sshll.u32 %s5473_s18, 4  ;;  %p5044_p5 = scmp.ne.s32.totalorder %s6758_s6, %s5043_s24  ;;  %s506_s14 = int_to_ptr.vmem [resolvable:$true] %s505_s14 }
 0x128   : > { %p5050_p4 = scmp.lt.u32.totalorder %s5043_s24, %s6758_s6 }
 0x129   : > { %p5046_p0 = pnand %p5044_p5, %p5683_p7 }
 0x12b   : > { %p5047_p2 = pneg %p5046_p0 }
 0x12d   : > { %p5052_p6 = pnand %p5050_p4, %p5047_p2 }
 0x12f   : > { %5055 = shalt.err (!%p5052_p6)
}
 0x130   : > { %s5056_s5 = scalar_lea.vmem %s506_s14, 512  ;;  %p5064_p13 = scmp.lt.s32.totalorder %s506_s14, %s506_s14 }
 0x131   : > { %p5057_p12 = scmp.ne.s32.totalorder %s506_s14, %s5056_s5  ;;  %p5065_p3 = scmp.lt.s32.totalorder %s5056_s5, %s5056_s5 }
 0x133   : > { %p5059_p1 = pnand %p5057_p12, %p5683_p7  ;;  %p5066_p8 = por %p5065_p3, %p5064_p13 }
 0x135   : > { %p5060_p11 = pneg %p5059_p1 }
 0x137   : > { %p5067_p10 = pnand %p5066_p8, %p5060_p11 }
 0x139   : > { %5070 = shalt.err (!%p5067_p10)
}
 0x13a   : > { %p6865_p5 = scmp.ne.s32.totalorder %s6840_s0, 0  ;;  %s6866_s26 = smov 8  }
 0x13b   : > { %s6867_s18 = smov 128   ;;  %s5474_s27 = smov [#allocation16]  }
 0x13c   : > { %4572 = dma.hbm_to_vmem [thread:$0]  (!%p6865_p5), %s6758_s6, 512, %s506_s14, [#allocation12], %s6867_s18, %s6867_s18, %s6866_s26  }
 0x13d   : > { %s529_s29 = sshll.u32 %s5474_s27, 4  ;;  %s5475_s11 = smov [#allocation19]   ;;  %s530_s29 = int_to_ptr.vmem [resolvable:$true] %s529_s29 }
 0x13e   : > { %s553_s28 = sshll.u32 %s5475_s11, 4  ;;  %s5071_s16 = scalar_lea.hbm %s6760_s8, 512  ;;  %s554_s28 = int_to_ptr.vmem [resolvable:$true] %s553_s28 }
 0x13f   : > { %p5072_p10 = scmp.ne.s32.totalorder %s6760_s8, %s5071_s16  ;;  %p5078_p4 = scmp.lt.u32.totalorder %s5071_s16, %s6760_s8 }
 0x141   : > { %p5074_p0 = pnand %p5072_p10, %p5683_p7 }
 0x143   : > { %p5075_p2 = pneg %p5074_p0 }
 0x145   : > { %p5080_p6 = pnand %p5078_p4, %p5075_p2 }
 0x147   : > { %5083 = shalt.err (!%p5080_p6)
}
 0x148   : > { %s5084_s14 = scalar_lea.vmem %s530_s29, 512  ;;  %p5092_p13 = scmp.lt.s32.totalorder %s530_s29, %s530_s29 }
 0x149   : > { %p5085_p12 = scmp.ne.s32.totalorder %s530_s29, %s5084_s14  ;;  %p5093_p3 = scmp.lt.s32.totalorder %s5084_s14, %s5084_s14 }
 0x14b   : > { %p5087_p1 = pnand %p5085_p12, %p5683_p7  ;;  %p5094_p8 = por %p5093_p3, %p5092_p13 }
 0x14d   : > { %p5088_p11 = pneg %p5087_p1 }
 0x14f   : > { %p5095_p9 = pnand %p5094_p8, %p5088_p11 }
 0x151   : > { %5098 = shalt.err (!%p5095_p9)
}
 0x152   : > { %4578 = dma.hbm_to_vmem [thread:$0]  (!%p6865_p5), %s6760_s8, 512, %s530_s29, [#allocation15], %s6867_s18, %s6867_s18, %s6866_s26  }
 0x153   : > { %s6868_s7 = sld [smem:[#allocation63_spill]] }
 0x159   : > { %s5099_s16 = scalar_lea.hbm %s6868_s7, 512 }
 0x15a   : > { %p5100_p10 = scmp.ne.s32.totalorder %s6868_s7, %s5099_s16  ;;  %p5106_p2 = scmp.lt.u32.totalorder %s5099_s16, %s6868_s7 }
 0x15c   : > { %p5102_p9 = pnand %p5100_p10, %p5683_p7 }
 0x15e   : > { %p5103_p0 = pneg %p5102_p9 }
 0x160   : > { %p5108_p4 = pnand %p5106_p2, %p5103_p0 }
 0x162   : > { %5111 = shalt.err (!%p5108_p4)
}
 0x163   : > { %s5112_s14 = scalar_lea.vmem %s554_s28, 512  ;;  %p5120_p11 = scmp.lt.s32.totalorder %s554_s28, %s554_s28 }
 0x164   : > { %p5113_p6 = scmp.ne.s32.totalorder %s554_s28, %s5112_s14  ;;  %p5121_p13 = scmp.lt.s32.totalorder %s5112_s14, %s5112_s14 }
 0x166   : > { %p5115_p12 = pnand %p5113_p6, %p5683_p7  ;;  %p5122_p3 = por %p5121_p13, %p5120_p11 }
 0x168   : > { %p5116_p1 = pneg %p5115_p12 }
 0x16a   : > { %p5123_p8 = pnand %p5122_p3, %p5116_p1 }
 0x16c   : > { %5126 = shalt.err (!%p5123_p8)
}
 0x16d   : > { %4584 = dma.hbm_to_vmem [thread:$0]  (!%p6865_p5), %s6868_s7, 512, %s554_s28, [#allocation18], %s6867_s18, %s6867_s18, %s6866_s26  }
 0x16e   : > { %s5476_s27 = smov [#allocation22]   ;;  %s5477_s3 = smov [#allocation25]  }
 0x16f   : > { %s578_s11 = sshll.u32 %s5476_s27, 4  ;;  %s600_s16 = sshll.u32 %s5477_s3, 4  ;;  %s579_s11 = int_to_ptr.vmem [resolvable:$true] %s578_s11  ;;  %s601_s16 = int_to_ptr.vmem [resolvable:$true] %s600_s16 }
 0x170   : > { %s6869_s5 = sld [smem:[#allocation65_spill]] }
 0x176   : > { %s5127_s12 = scalar_lea.hbm %s6869_s5, 128 }
 0x177   : > { %p5128_p10 = scmp.ne.s32.totalorder %s6869_s5, %s5127_s12  ;;  %p5134_p2 = scmp.lt.u32.totalorder %s5127_s12, %s6869_s5 }
 0x179   : > { %p5130_p9 = pnand %p5128_p10, %p5683_p7 }
 0x17b   : > { %p5131_p0 = pneg %p5130_p9 }
 0x17d   : > { %p5136_p4 = pnand %p5134_p2, %p5131_p0 }
 0x17f   : > { %5139 = shalt.err (!%p5136_p4)
}
 0x180   : > { %s5140_s28 = scalar_lea.vmem %s579_s11, 128  ;;  %p5148_p11 = scmp.lt.s32.totalorder %s579_s11, %s579_s11 }
 0x181   : > { %p5141_p6 = scmp.ne.s32.totalorder %s579_s11, %s5140_s28  ;;  %p5149_p13 = scmp.lt.s32.totalorder %s5140_s28, %s5140_s28 }
 0x183   : > { %p5143_p12 = pnand %p5141_p6, %p5683_p7  ;;  %p5150_p3 = por %p5149_p13, %p5148_p11 }
 0x185   : > { %p5144_p1 = pneg %p5143_p12 }
 0x187   : > { %p5151_p8 = pnand %p5150_p3, %p5144_p1 }
 0x189   : > { %5154 = shalt.err (!%p5151_p8)
}
 0x18a   : > { %4590 = dma.hbm_to_vmem [thread:$0]  (!%p6865_p5), %s6869_s5, 128, %s579_s11, [#allocation21]  }
 0x18b   : > { %s6870_s3 = sld [smem:[#allocation67_spill]] }
 0x191   : > { %s5155_s13 = scalar_lea.hbm %s6870_s3, 128 }
 0x192   : > { %p5156_p10 = scmp.ne.s32.totalorder %s6870_s3, %s5155_s13  ;;  %p5162_p2 = scmp.lt.u32.totalorder %s5155_s13, %s6870_s3 }
 0x194   : > { %p5158_p9 = pnand %p5156_p10, %p5683_p7 }
 0x196   : > { %p5159_p0 = pneg %p5158_p9 }
 0x198   : > { %p5164_p4 = pnand %p5162_p2, %p5159_p0 }
 0x19a   : > { %5167 = shalt.err (!%p5164_p4)
}
 0x19b   : > { %s5168_s28 = scalar_lea.vmem %s601_s16, 128  ;;  %p5176_p11 = scmp.lt.s32.totalorder %s601_s16, %s601_s16 }
 0x19c   : > { %p5169_p6 = scmp.ne.s32.totalorder %s601_s16, %s5168_s28  ;;  %p5177_p13 = scmp.lt.s32.totalorder %s5168_s28, %s5168_s28 }
 0x19e   : > { %p5171_p12 = pnand %p5169_p6, %p5683_p7  ;;  %p5178_p3 = por %p5177_p13, %p5176_p11 }
 0x1a0   : > { %p5172_p1 = pneg %p5171_p12 }
 0x1a2   : > { %p5179_p8 = pnand %p5178_p3, %p5172_p1 }
 0x1a4   : > { %5182 = shalt.err (!%p5179_p8)
}
 0x1a5   : > { %4596 = dma.hbm_to_vmem [thread:$0]  (!%p6865_p5), %s6870_s3, 128, %s601_s16, [#allocation24]  }
 0x1a6   : > { %s5478_s24 = smov [#allocation28]   ;;  %s6871_s15 = sld [smem:[#allocation69_spill]] }
 0x1a7   : > { %s624_s22 = sshll.u32 %s5478_s24, 4  ;;  %s625_s22 = int_to_ptr.vmem [resolvable:$true] %s624_s22 }
 0x1ac   : > { %s5183_s12 = scalar_lea.hbm %s6871_s15, 16 }
 0x1ad   : > { %p5184_p10 = scmp.ne.s32.totalorder %s6871_s15, %s5183_s12  ;;  %p5190_p2 = scmp.lt.u32.totalorder %s5183_s12, %s6871_s15 }
 0x1af   : > { %p5186_p9 = pnand %p5184_p10, %p5683_p7 }
 0x1b1   : > { %p5187_p0 = pneg %p5186_p9 }
 0x1b3   : > { %p5192_p4 = pnand %p5190_p2, %p5187_p0 }
 0x1b5   : > { %5195 = shalt.err (!%p5192_p4)
}
 0x1b6   : > { %s5196_s16 = scalar_lea.vmem %s625_s22, 16  ;;  %s5203_s11 = scalar_lea.vmem %s625_s22, 32 }
 0x1b7   : > { %p5197_p6 = scmp.ne.s32.totalorder %s625_s22, %s5196_s16  ;;  %p5204_p11 = scmp.lt.s32.totalorder %s625_s22, %s625_s22 }
 0x1b8   : > { %p5205_p13 = scmp.lt.s32.totalorder %s5203_s11, %s5196_s16 }
 0x1b9   : > { %p5199_p12 = pnand %p5197_p6, %p5683_p7 }
 0x1ba   : > { %p5206_p3 = por %p5205_p13, %p5204_p11 }
 0x1bb   : > { %p5200_p1 = pneg %p5199_p12 }
 0x1bd   : > { %p5207_p8 = pnand %p5206_p3, %p5200_p1 }
 0x1bf   : > { %5210 = shalt.err (!%p5207_p8)
}
 0x1c0   : > { %s6872_s5 = sld [smem:[#allocation45_spill]]  ;;  %s6873_s27 = sld [smem:[#allocation44_spill]] }
 0x1c1   : > { %s6874_s17 = sld [smem:[#allocation43_spill]]  ;;  %p6875_p10 = scmp.eq.s32.totalorder %s5857_s4, 0 }
 0x1c2   : > { %4602 = dma.hbm_to_vmem [thread:$0]  (!%p6865_p5), %s6871_s15, 16, %s625_s22, [#allocation27]  }
 0x1c3   : > { %p6876_p9 = scmp.eq.s32.totalorder %s5459_s1, 0  ;;  %s4021_s14 = sshll.u32 %s5455_s19, 8 }
 0x1c4   : > { %p6877_p4 = scmp.eq.s32.totalorder %s5654_s20, 0  ;;  %s6879_s11 = sld [smem:[#allocation56_spill]] }
 0x1c5   : > { %p6880_p5 = scmp.lt.s32.totalorder %s5459_s1, 4 }
 0x1c6   : > { %s64_s13 = sadd.s32 1, %s6872_s5  ;;  %p71_p7 = scmp.ne.s32.totalorder %s6872_s5, %s6873_s27 }
 0x1c7   : > { %s6062_s0 = scalar_select %p6875_p10, %s6872_s5, %s64_s13  }
 0x1c8   : > { %p73_p0 = por %p6876_p9, %p71_p7  ;;  %p77_p2 = scmp.ne.s32.totalorder %s6873_s27, %s6874_s17 }
 0x1c9   : > { %s6069_s12 = sand.u32 1, %s6872_s5  }
 0x1ca   : > { %p6074_p6 = por %p6877_p4, %p77_p2  ;;  %s3894_s28 = sshll.u32 %s6069_s12, 4 }
 0x1cb   : > { %s6082_s4 = scalar_lea.hbm %s6879_s11, %s4021_s14  ;;  %p6086_p12 = pnand %p6880_p5, %p73_p0 }
 0x1cc   : > { %s6878_s29 = scalar_select %p6074_p6, 1, 0 }
 0x1cd   : > { %s639_s24 = scalar_lea.vmem [#allocation2], %s3894_s28  ;;  %s636_s27 = scalar_lea.sflag [#allocation3], %s6069_s12 }
 0x1ce   : > { %s646_s5 = sshll.u32 %s639_s24, 4  ;;  %s5211_s17 = scalar_lea.hbm %s6082_s4, 256  ;;  %s6090_s5 = int_to_ptr.vmem [resolvable:$true] %s646_s5 }
 0x1cf   : > { %p5212_p1 = scmp.ne.s32.totalorder %s6082_s4, %s5211_s17  ;;  %p6813_p11 = pneg %p6086_p12 }
 0x1d0   : > { %s5216_s22 = scalar_lea.hbm %s6879_s11, 512  ;;  %p5217_p8 = scmp.lt.u32.totalorder %s6082_s4, %s6879_s11 }
 0x1d1   : > { %p5214_p13 = pnand %p6813_p11, %p5212_p1  ;;  %p5218_p7 = scmp.lt.u32.totalorder %s5216_s22, %s5211_s17 }
 0x1d2   : > { %p5220_p9 = scmp.lt.u32.totalorder %s5211_s17, %s6082_s4 }
 0x1d3   : > { %p5215_p3 = pneg %p5214_p13  ;;  %p5219_p10 = por %p5218_p7, %p5217_p8 }
 0x1d5   : > { %p5221_p0 = por %p5220_p9, %p5219_p10 }
 0x1d7   : > { %p5222_p2 = pnand %p5221_p0, %p5215_p3 }
 0x1d9   : > { %5225 = shalt.err (!%p5222_p2)
}
 0x1da   : > { %s5226_s28 = scalar_lea.vmem %s6090_s5, 256  ;;  %s5479_s24 = smov [#allocation2]  }
 0x1db   : > { %p5227_p4 = scmp.ne.s32.totalorder %s6090_s5, %s5226_s28  ;;  %s5231_s13 = sshll.u32 %s5479_s24, 4  ;;  %s5232_s13 = int_to_ptr.vmem [resolvable:$false] %s5231_s13 }
 0x1dc   : > { %s5233_s3 = scalar_lea.vmem %s5232_s13, 512  ;;  %p5234_p13 = scmp.lt.s32.totalorder %s6090_s5, %s5232_s13 }
 0x1dd   : > { %p5229_p5 = pnand %p5227_p4, %p6813_p11  ;;  %p5235_p8 = scmp.lt.s32.totalorder %s5233_s3, %s5226_s28 }
 0x1df   : > { %p5230_p1 = pneg %p5229_p5  ;;  %p5236_p7 = por %p5235_p8, %p5234_p13 }
 0x1e1   : > { %p5237_p10 = pnand %p5236_p7, %p5230_p1 }
 0x1e3   : > { %5240 = shalt.err (!%p5237_p10)
}
 0x1e4   : > { %4606 = dma.hbm_to_vmem [thread:$0]  (!%p6086_p12), %s6082_s4, 256, %s6090_s5, %s636_s27, %s6867_s18, %s6867_s18, %s6866_s26  }
 0x1e5   : > { %s5241_s17 = scalar_lea.hbm %s5934_s30, 1024  ;;  %p6882_p9 = scmp.ne.s32.totalorder %s6860_s21, 0 }
 0x1e6   : > { %p5242_p3 = scmp.ne.s32.totalorder %s5934_s30, %s5241_s17  ;;  %s5246_s16 = scalar_lea.hbm %s6754_s2, 4096 }
 0x1e7   : > { %p6883_p0 = pneg %p6882_p9  ;;  %p5247_p5 = scmp.lt.u32.totalorder %s5934_s30, %s6754_s2 }
 0x1e8   : > { %p5248_p1 = scmp.lt.u32.totalorder %s5246_s16, %s5241_s17  ;;  %p5250_p8 = scmp.lt.u32.totalorder %s5241_s17, %s5934_s30 }
 0x1e9   : > { %p5244_p2 = pnand %p5242_p3, %p6883_p0 }
 0x1ea   : > { %p5249_p13 = por %p5248_p1, %p5247_p5 }
 0x1eb   : > { %p5245_p4 = pneg %p5244_p2 }
 0x1ec   : > { %p5251_p7 = por %p5250_p8, %p5249_p13 }
 0x1ee   : > { %p5252_p10 = pnand %p5251_p7, %p5245_p4 }
 0x1f0   : > { %5255 = shalt.err (!%p5252_p10)
}
 0x1f1   : > { %s5256_s26 = scalar_lea.vmem %s5937_s23, 1024  ;;  %s5480_s18 = smov [#allocation7]  }
 0x1f2   : > { %p5257_p3 = scmp.ne.s32.totalorder %s5937_s23, %s5256_s26  ;;  %s5261_s4 = sshll.u32 %s5480_s18, 4  ;;  %s5262_s4 = int_to_ptr.vmem [resolvable:$false] %s5261_s4 }
 0x1f3   : > { %s5263_s5 = scalar_lea.vmem %s5262_s4, 2048  ;;  %p5264_p6 = scmp.lt.s32.totalorder %s5937_s23, %s5262_s4 }
 0x1f4   : > { %p5259_p2 = pnand %p5257_p3, %p6883_p0  ;;  %p5265_p5 = scmp.lt.s32.totalorder %s5263_s5, %s5256_s26 }
 0x1f6   : > { %p5260_p11 = pneg %p5259_p2  ;;  %p5266_p1 = por %p5265_p5, %p5264_p6 }
 0x1f8   : > { %p5267_p13 = pnand %p5266_p1, %p5260_p11 }
 0x1fa   : > { %5270 = shalt.err (!%p5267_p13)
}
 0x1fb   : > { %s6884_s27 = smov 4   ;;  %s6885_s13 = smov 64  }
 0x1fc   : > { %4612 = dma.hbm_to_vmem [thread:$0]  (!%p6882_p9), %s5934_s30, 1024, %s5937_s23, %s5898_s9, %s6885_s13, %s6885_s13, %s6884_s27  }
 0x1fd   : > { %s3907_s3 = sshll.u32 %s5455_s19, 4  ;;  %s6886_s22 = sld [smem:[#allocation58_spill]] }
 0x1fe   : > { %s707_s21 = scalar_lea.vmem [#allocation8], %s6069_s12  ;;  %s6887_s24 = sand.u32 1, %s5459_s1  }
 0x1ff   : > { %s714_s28 = sshll.u32 %s707_s21, 4  ;;  %s705_s26 = scalar_lea.sflag [#allocation9], %s6887_s24  ;;  %s715_s28 = int_to_ptr.vmem [resolvable:$true] %s714_s28 }
 0x200   : > { %p6888_p11 = pneg %p6086_p12 }
 0x203   : > { %s6154_s16 = scalar_lea.hbm %s6886_s22, %s3907_s3  ;;  %s5276_s30 = scalar_lea.hbm %s6886_s22, 32 }
 0x204   : > { %s5271_s18 = scalar_lea.hbm %s6154_s16, 16  ;;  %p5277_p8 = scmp.lt.u32.totalorder %s6154_s16, %s6886_s22 }
 0x205   : > { %p5272_p6 = scmp.ne.s32.totalorder %s6154_s16, %s5271_s18  ;;  %p5278_p7 = scmp.lt.u32.totalorder %s5276_s30, %s5271_s18 }
 0x206   : > { %p5280_p3 = scmp.lt.u32.totalorder %s5271_s18, %s6154_s16 }
 0x207   : > { %p5274_p9 = pnand %p5272_p6, %p6888_p11  ;;  %p5279_p10 = por %p5278_p7, %p5277_p8 }
 0x209   : > { %p5275_p4 = pneg %p5274_p9  ;;  %p5281_p0 = por %p5280_p3, %p5279_p10 }
 0x20b   : > { %p5282_p2 = pnand %p5281_p0, %p5275_p4 }
 0x20d   : > { %5285 = shalt.err (!%p5282_p2)
}
 0x20e   : > { %s5286_s12 = scalar_lea.vmem %s715_s28, 16  ;;  %p6889_p1 = pmov %p6888_p11 }
 0x20f   : > { %p5287_p5 = scmp.ne.s32.totalorder %s715_s28, %s5286_s12  ;;  %s5481_s27 = smov [#allocation8]  }
 0x210   : > { %s5291_s13 = sshll.u32 %s5481_s27, 4  ;;  %s5292_s13 = int_to_ptr.vmem [resolvable:$false] %s5291_s13 }
 0x211   : > { %p5289_p13 = pnand %p5287_p5, %p6889_p1  ;;  %s5293_s3 = scalar_lea.vmem %s5292_s13, 32 }
 0x212   : > { %p5294_p11 = scmp.lt.s32.totalorder %s715_s28, %s5292_s13  ;;  %p5295_p9 = scmp.lt.s32.totalorder %s5293_s3, %s5286_s12 }
 0x213   : > { %p5290_p6 = pneg %p5289_p13 }
 0x214   : > { %p5296_p7 = por %p5295_p9, %p5294_p11 }
 0x216   : > { %p5297_p8 = pnand %p5296_p7, %p5290_p6 }
 0x218   : > { %5300 = shalt.err (!%p5297_p8)
}
 0x219   : > { %4615 = dma.hbm_to_vmem [thread:$0]  (!%p6086_p12), %s6154_s16, 16, %s715_s28, %s705_s26  }
 0x21a   : > { %s6890_s17 = sld [smem:[#allocation49_spill]] }
 0x220   : > { %p6891_p4 = scmp.ne.s32.totalorder %s6890_s17, 0 }
 0x221   : > { %s6892_s14 = sld [smem:[#allocation44_spill]] (!%p6891_p4)  ;;  %p6893_p10 = scmp.ne.s32.totalorder (!%p6891_p4), %s6878_s29, 0 }
 0x222   : > { %723 = sbr.rel (%p6891_p4) target bundleno = 2375 (0x947), region = 88 }
 0x227   : > { %s6181_s21 = sand.u32 (!%p6891_p4), 1, %s6892_s14  }
 0x228   : > { %s3909_s24 = sshll.u32 (!%p6891_p4), %s6181_s21, 4  ;;  %s726_s18 = scalar_lea.sflag (!%p6891_p4), [#allocation3], %s6181_s21 }
 0x229   : > { %s6185_s23 = scalar_lea.vmem [#allocation2], %s3909_s24 }
 0x22a   : > { %5374 = dma.done.wait (%p6893_p10), %s726_s18, 256  }
 0x22b   : > { %5376 = vsyncadd (%p6893_p10), %s726_s18, 4294967040  ;;  %s6894_s10 = sld [smem:[#allocation52_spill]]  ;;  %s734_s16 = sand.u32 1, %s5654_s20  }
 0x22c   : > { %s6193_s28 = sand.u32 1, %s5423_s25   ;;  %s735_s9 = scalar_lea.sflag [#allocation6], %s734_s16 }
 0x22d   : > { %s3910_s26 = sshll.u32 %s6193_s28, 6 }
 0x22e   : > { %s6196_s30 = scalar_lea.vmem [#allocation5], %s3910_s26 }
 0x231   : > { %p6895_p12 = scmp.ne.s32.totalorder %s6894_s10, 0 }
 0x233   : > { %5378 = dma.done.wait (%p6895_p12), %s735_s9, 2048  }
 0x234   : > { %5380 = vsyncadd (%p6895_p12), %s735_s9, 4294965248  ;;  %s6202_s4 = scalar_lea.vmem [#allocation7], %s3910_s26  ;;  %s753_s5 = scalar_lea.sflag [#allocation9], %s734_s16 }
 0x235   : > { %s755_s12 = scalar_lea.vmem [#allocation8], %s6181_s21 }
 0x236   : > { %5382 = dma.done.wait (%p6893_p10), %s753_s5, 16  }
 0x237   : > { %5384 = vsyncadd (%p6893_p10), %s753_s5, 4294967280  ;;  %p6896_p3 = scmp.eq.s32.totalorder %s5654_s20, 0 }
 0x239   : > { %5386 = dma.done.wait (%p6896_p3), [#allocation9], 16   ;;  %p6897_p0 = pmov %p6896_p3 }
 0x23b   : > { %5388 = vsyncadd (%p6897_p0), [#allocation9], 4294967280  ;;  %p6898_p2 = pmov %p6897_p0 }
 0x23c   : > { %p6899_p5 = pmov %p6897_p0 }
 0x23d   : > { %5390 = dma.done.wait (%p6898_p2), [#allocation12], 528  }
 0x23e   : > { %5392 = vsyncadd (%p6899_p5), [#allocation12], 4294966768  ;;  %p6900_p1 = pmov %p6897_p0 }
 0x23f   : > { %p6901_p13 = pmov %p6897_p0 }
 0x240   : > { %5394 = dma.done.wait (%p6900_p1), [#allocation15], 528  }
 0x241   : > { %5396 = vsyncadd (%p6901_p13), [#allocation15], 4294966768  ;;  %p6902_p6 = pmov %p6897_p0 }
 0x242   : > { %p6903_p11 = pmov %p6897_p0 }
 0x243   : > { %5398 = dma.done.wait (%p6902_p6), [#allocation18], 528  }
 0x244   : > { %5400 = vsyncadd (%p6903_p11), [#allocation18], 4294966768  ;;  %p6904_p9 = pmov %p6897_p0 }
 0x245   : > { %p6905_p7 = pmov %p6897_p0 }
 0x246   : > { %5402 = dma.done.wait (%p6904_p9), [#allocation21], 144  }
 0x247   : > { %5404 = vsyncadd (%p6905_p7), [#allocation21], 4294967152  ;;  %p6906_p8 = pmov %p6897_p0 }
 0x248   : > { %p6907_p4 = pmov %p6897_p0 }
 0x249   : > { %5406 = dma.done.wait (%p6906_p8), [#allocation24], 256  }
 0x24a   : > { %5408 = vsyncadd (%p6907_p4), [#allocation24], 4294967040  ;;  %p6908_p10 = pmov %p6897_p0 }
 0x24b   : > { %p6909_p12 = pmov %p6897_p0 }
 0x24c   : > { %5410 = dma.done.wait (%p6908_p10), [#allocation27], 528  }
 0x24d   : > { %5412 = vsyncadd (%p6909_p12), [#allocation27], 4294966768  ;;  %s6910_s29 = sld [smem:[#allocation46_spill]]  ;;  %vm878_vm0 = vcmask 261120   ;;  %v877_v1 = vld [vmem:[%s6185_s23 + $0x8] sm:$0xff]  ;;  %v876_v2 = vld [vmem:[%s6185_s23] sm:$0xff] }
 0x24e   : > { %v882_v4 = vsel %vm878_vm0, %v877_v1, 0.0  ;;  %v879_v5 = vsel %vm878_vm0, %v876_v2, 0.0  ;;  %v940_v21 = vld [vmem:[#allocation13] sm:$0xff]  ;;  %v941_v22 = vld [vmem:[#allocation13 + $0x8] sm:$0xff]  ;;  %v5482_v24 = vmov 0.0|0.0   ;;  %v942_v25 = vld [vmem:[#allocation13 + $0x10] sm:$0xff] }
 0x24f   : > { %883 = vadd.xlane.f32.xlu1 %v882_v4  ;;  %v4379_v23 = vpack.c.bf16 %v941_v22, %v940_v21  ;;  %4378 = vmatprep.subr.bf16.mxu0 %v5482_v24  ;;  %v943_v26 = vld [vmem:[#allocation13 + $0x18] sm:$0xff]  ;;  %v1024_v28 = vld [vmem:[#allocation16] sm:$0xff]  ;;  %v1025_v29 = vld [vmem:[#allocation16 + $0x8] sm:$0xff]  ;;  %vm5483_vm1 = vmmov 0   ;;  %v5484_v31 = vmov 0.0   ;;  %vm1301_vm2 = vcmask 64512  }
 0x250   : > { %4406 = vmatprep.subr.bf16.mxu1 %v5482_v24  ;;  %v4382_v27 = vpack.c.bf16 %v943_v26, %v942_v25  ;;  %v4384_v30 = vpack.c.bf16 %v1025_v29, %v1024_v28  ;;  %4200 = vmatprep.mubr.msk.f32.mxu0 %vm5483_vm1, %v5484_v31  ;;  %v3926_v42 = vld [vmem:[#allocation10] ss:$0 sm:$0xff]  ;;  %v3927_v44 = vld [vmem:[#allocation11] ss:$0 sm:$0xff]  ;;  %v1026_v45 = vld [vmem:[#allocation16 + $0x10] sm:$0xff]  ;;  %s5486_s20 = smov 120  }
 0x251   : > { %4380 = vmatpush3.bf16.msra.mxu0 %v4379_v23  ;;  %4273 = vmatprep.mubr.msk.f32.mxu1 %vm5483_vm1, %v5484_v31  ;;  %v1027_v46 = vld [vmem:[#allocation16 + $0x18] sm:$0xff]  ;;  %v1116_v54 = vld [vmem:[#allocation19] sm:$0xff]  ;;  %v1117_v55 = vld [vmem:[#allocation19 + $0x8] sm:$0xff]  ;;  %s5487_s3 = smov 124   ;;  %s5488_s17 = smov 96   ;;  %vm1926_vm4 = vcmask 130048  }
 0x252   : > { %4381 = vmatprep.subr.bf16.mxu0 %v5482_v24  ;;  %v4388_v52 = vpack.c.bf16 %v1027_v46, %v1026_v45  ;;  %v4392_v58 = vpack.c.bf16 %v1117_v55, %v1116_v54  ;;  %v1118_v60 = vld [vmem:[#allocation19 + $0x10] sm:$0xff]  ;;  %v1119_v61 = vld [vmem:[#allocation19 + $0x18] sm:$0xff]  ;;  %vm6261_vm3 = vmpackc.low %vm1301_vm2, %vm1301_vm2  ;;  %s5489_s14 = smov 112   ;;  %s5490_s24 = smov 80   ;;  %vm3487_vm5 = vcmask 31744   ;;  %vm3490_vm6 = vcmask 97280  }
 0x253   : > { %s3928_s27 = sshll.u32 %s6910_s29, 3  ;;  %v4396_v63 = vpack.c.bf16 %v1119_v61, %v1118_v60  ;;  %v4097_v4 = vld [vmem:[%s6202_s4 + $0x18] sm:$0xff]   ;;  %s5491_s18 = smov 48   ;;  %vm3493_vm7 = vcmask 162816   ;;  %vm3495_vm8 = vcmask 195584   ;;  %vm3497_vm9 = vcmask 228352  }
 0x254   : > { %s923_s13 = scalar_lea.vmem %s6185_s23, %s3928_s27 [#allocation2]  ;;  %s5492_s23 = smov 64  }
 0x255   : > { %v924_v0 = vld [vmem:[%s923_s13] sm:$0xff]  ;;  %4383 = vmatpush3.bf16.msra.mxu0 %v4382_v27  ;;  %v3931_v27 = vld [vmem:[#allocation17] ss:$0 sm:$0xff]  ;;  %s5493_s10 = smov 16   ;;  %s5494_s16 = smov 32  }
 0x256   : > { %v925_v3 = vsel %vm878_vm0, %v924_v0, 0.0  ;;  %4385 = vmatprep.subr.bf16.mxu0 %v4384_v30  ;;  %s5495_s26 = smov 116   ;;  %s5496_s9 = smov 104  }
 0x257   : > { %926 = vadd.xlane.f32.xlu0 %v925_v3  ;;  %v4096_v3 = vld [vmem:[%s6202_s4 + $0x10] sm:$0xff]   ;;  %s5500_s21 = smov 100   ;;  %s5502_s5 = smov 4  }
 0x258   : > { %s5504_s27 = smov 24   ;;  %s5505_s13 = smov 20  }
 0x25b   : > { %880 = vadd.xlane.f32.xlu0 %v879_v5  ;;  %v4098_v5 = vld [vmem:[%s6202_s4 + $0x20] sm:$0xff]  }
 0x2dc   : > { %v884_v7 = vpop.xlane.xlu1 %883 }
 0x2dd   : > { %v887_v9 = vmul.f32 0.03125, %v884_v7  ;;  %v4100_v7 = vld [vmem:[%s6202_s4 + $0x30] sm:$0xff]  }
 0x2df   : > { %v889_v11 = vsub.f32 %v877_v1, %v887_v9  ;;  %v4057_v1 = vld [vmem:[%s6202_s4] sm:$0xff]   ;;  %v1502_v9 = vld [vmem:[#allocation23] sm:$0xff] }
 0x2e0   : > { %4409 = vmatpush3.bf16.xpose.msk.msra.mxu1 %vm6261_vm3, %v4057_v1  ;;  %v4088_v1 = vld [vmem:[%s6196_s30 + $0x8] sm:$0xff]  }
 0x2e1   : > { %v891_v15 = vmul.f32 %v889_v11, %v889_v11  ;;  %4410 = vmatprep.subr.bf16.mxu1 %v5482_v24 }
 0x2e3   : > { %v895_v18 = vsel %vm878_vm0, %v891_v15, 0.0 }
 0x2e4   : > { %v927_v6 = vpop.xlane.xlu0 %926 }
 0x2e5   : > { %v928_v8 = vmul.f32 0.03125, %v927_v6  ;;  %v4099_v6 = vld [vmem:[%s6202_s4 + $0x28] sm:$0xff]  }
 0x2e7   : > { %v929_v10 = vsub.f32 %v924_v0, %v928_v8  ;;  %v4101_v8 = vld [vmem:[%s6202_s4 + $0x38] sm:$0xff]  }
 0x2e8   : > { %v881_v12 = vpop.xlane.xlu0 %880 }
 0x2e9   : > { %v886_v13 = vmul.f32 0.03125, %v881_v12  ;;  %v930_v14 = vmul.f32 %v929_v10, %v929_v10  ;;  %v1208_v12 = vlaneseq }
 0x2eb   : > { %v888_v16 = vsub.f32 %v876_v2, %v886_v13  ;;  %v931_v17 = vsel %vm878_vm0, %v930_v14, 0.0  ;;  %v4095_v2 = vld [vmem:[%s6202_s4 + $0x8] sm:$0xff]   ;;  %v6300_v14 = vshrl.u32 %v1208_v12, 7  ;;  %s5501_s4 = smov 8  }
 0x2ec   : > { %932 = vadd.xlane.f32.xlu1 %v931_v17  ;;  %4413 = vmatpush3.bf16.xpose.msk.msra.mxu1 %vm6261_vm3, %v4095_v2 }
 0x2ed   : > { %v890_v19 = vmul.f32 %v888_v16, %v888_v16  ;;  %4414 = vmatprep.subr.bf16.mxu1 %v5482_v24 }
 0x2ef   : > { %v892_v20 = vsel %vm878_vm0, %v890_v19, 0.0 }
 0x2f0   : > { %896 = vadd.xlane.f32.xlu1 %v895_v18  ;;  %893 = vadd.xlane.f32.xlu0 %v892_v20  ;;  %v1255_v18 = vsub.s32 0, %v6300_v14  ;;  %v3929_v20 = vld [vmem:[#allocation14] ss:$0 sm:$0xff] }
 0x2f4   : > { %4417 = vmatpush3.bf16.xpose.msk.msra.mxu1 %vm6261_vm3, %v4096_v3  ;;  %v4089_v3 = vld [vmem:[%s6196_s30 + $0x10] sm:$0xff]  }
 0x2f5   : > { %4418 = vmatprep.subr.bf16.mxu1 %v5482_v24 }
 0x2fc   : > { %4421 = vmatpush3.bf16.xpose.msk.msra.mxu1 %vm6261_vm3, %v4097_v4  ;;  %v4090_v4 = vld [vmem:[%s6196_s30 + $0x18] sm:$0xff]  }
 0x2fd   : > { %4422 = vmatprep.subr.bf16.mxu1 %v5482_v24 }
 0x304   : > { %4425 = vmatpush3.bf16.xpose.msk.msra.mxu1 %vm6261_vm3, %v4098_v5  ;;  %v4091_v5 = vld [vmem:[%s6196_s30 + $0x20] sm:$0xff]  }
 0x305   : > { %4426 = vmatprep.subr.bf16.mxu1 %v5482_v24 }
 0x30c   : > { %4429 = vmatpush3.bf16.xpose.msk.msra.mxu1 %vm6261_vm3, %v4099_v6  ;;  %v4092_v6 = vld [vmem:[%s6196_s30 + $0x28] sm:$0xff]  }
 0x30d   : > { %4430 = vmatprep.subr.bf16.mxu1 %v5482_v24 }
 0x314   : > { %4433 = vmatpush3.bf16.xpose.msk.msra.mxu1 %vm6261_vm3, %v4100_v7  ;;  %v4093_v7 = vld [vmem:[%s6196_s30 + $0x30] sm:$0xff]  }
 0x315   : > { %4434 = vmatprep.subr.bf16.mxu1 %v5482_v24 }
 0x31c   : > { %4437 = vmatpush3.bf16.xpose.msk.msra.mxu1 %vm6261_vm3, %v4101_v8  ;;  %v4094_v8 = vld [vmem:[%s6196_s30 + $0x38] sm:$0xff]  }
 0x31d   : > { %4473 = vmatprep.subr.bf16.mxu1 %v5482_v24 }
 0x323   : > { %4274 = vmatmul.mubr.msk.f32.vlgmr.msra.gmra.mrb[0].mxu1 %vm1301_vm2, %v1502_v9  ;;  %v1501_v9 = vld [vmem:[#allocation22] sm:$0xff] }
 0x324   : > { %4322 = vmatprep.mubr.msk.f32.mxu1 %vm5483_vm1, %v5484_v31 }
 0x379   : > { %v933_v32 = vpop.xlane.xlu1 %932 }
 0x37a   : > { %v934_v33 = vmul.f32 0.03125, %v933_v32 }
 0x37c   : > { %v935_v34 = vadd.f32 1e-05, %v934_v33 }
 0x37d   : > { %v897_v35 = vpop.xlane.xlu1 %896  ;;  %v894_v36 = vpop.xlane.xlu0 %893 }
 0x37e   : > { %4779 = vrsqrt.f32 %v935_v34  ;;  %v899_v37 = vmul.f32 0.03125, %v897_v35  ;;  %v898_v38 = vmul.f32 0.03125, %v894_v36 }
 0x380   : > { %v901_v39 = vadd.f32 1e-05, %v899_v37  ;;  %v900_v40 = vadd.f32 1e-05, %v898_v38  ;;  %v3934_v38 = vld [vmem:[#allocation20] ss:$0 sm:$0xff] }
 0x382   : > { %4781 = vrsqrt.f32 %v901_v39 }
 0x383   : > { %4783 = vrsqrt.f32 %v900_v40 }
 0x388   : > { %v4780_v41 = vpop.eup %4779 }
 0x389   : > { %v937_v43 = vmul.f32 %v4780_v41, %v929_v10  ;;  %v5485_v10 = vmov 1966171168  }
 0x38b   : > { %v938_v47 = vmul.f32 %v3926_v42, %v937_v43 }
 0x38c   : > { %v4782_v48 = vpop.eup %4781 }
 0x38d   : > { %v4784_v49 = vpop.eup %4783  ;;  %v905_v50 = vmul.f32 %v4782_v48, %v889_v11  ;;  %v939_v51 = vadd.f32 %v3927_v44, %v938_v47  ;;  %v1206_v11 = vunpack.c.l.s4 %v5485_v10 }
 0x38e   : > { %v904_v53 = vmul.f32 %v4784_v49, %v888_v16  ;;  %v1202_v16 = vld [vmem:[#allocation25] sm:$0xff] }
 0x38f   : > { %4201 = vmatmul.mubr.msk.f32.vlgmr.msra.gmra.mrb[0].mxu0 %vm878_vm0, %v939_v51  ;;  %v913_v57 = vmul.f32 %v3926_v42, %v905_v50  ;;  %v1207_v13 = vunpack.c.0.s8 %v1206_v11 }
 0x390   : > { %4387 = vmatpush3.bf16.msra.mxu0 %v4384_v30  ;;  %v912_v56 = vmul.f32 %v3926_v42, %v904_v53  ;;  %v1204_v30 = vcombine.high %v1202_v16, %v1202_v16 }
 0x391   : > { %4389 = vmatprep.subr.bf16.mxu0 %v4388_v52  ;;  %v921_v62 = vadd.f32 %v3927_v44, %v913_v57  ;;  %v1210_v15 = vsub.s32 %v1207_v13, %v6300_v14 }
 0x392   : > { %v920_v59 = vadd.f32 %v3927_v44, %v912_v56 }
 0x393   : > { %v1211_v17 = vrot.slane %v1202_v16, %v1210_v15  ;;  %v1218_v37 = vrot.slane %v1204_v30, %v1210_v15 }
 0x394   : > { %4391 = vmatpush3.bf16.msra.mxu0 %v4388_v52  ;;  %4211 = vmatprep.mubr.msk.f32.mxu0 %vm878_vm0, %v920_v59  ;;  %v4025_v52 = vld [vmem:[%s6196_s30] sm:$0xff]   ;;  %s5497_s30 = smov 108  }
 0x395   : > { %4393 = vmatprep.subr.bf16.mxu0 %v4392_v58  ;;  %v1227_v19 = vrot.slane %v1211_v17, %v1210_v15  ;;  %v1219_v28 = vcombine.high %v1211_v17, %v1211_v17  ;;  %v1220_v43 = vcombine.high %v1218_v37, %v1218_v37  ;;  %v1234_v46 = vrot.slane %v1218_v37, %v1210_v15 }
 0x397   : > { %4212 = vmatmul.mubr.msk.f32.vlgmr.msra.gmra.mrb[2].mxu0 %vm878_vm0, %v921_v62  ;;  %v1256_v21 = vrot.slane %v1227_v19, %v1255_v18  ;;  %v1241_v36 = vrot.slane %v1219_v28, %v1210_v15  ;;  %v1249_v39 = vcombine.high %v1227_v19, %v1227_v19  ;;  %v1248_v50 = vrot.slane %v1220_v43, %v1210_v15 }
 0x398   : > { %4395 = vmatpush3.bf16.msra.mxu0 %v4392_v58  ;;  %4222 = vmatprep.mubr.msk.f32.mxu0 %vm878_vm0, %v920_v59  ;;  %v1272_v53 = vrot.slane %v1234_v46, %v1255_v18  ;;  %v1250_v54 = vcombine.high %v1234_v46, %v1234_v46  ;;  %v5498_v28 = vmov 1983009808  }
 0x399   : > { %4397 = vmatprep.subr.bf16.mxu0 %v4396_v63  ;;  %v1260_v41 = vrot.slane %v1241_v36, %v1255_v18  ;;  %v1251_v42 = vcombine.high %v1241_v36, %v1241_v36  ;;  %v1264_v47 = vrot.slane %v1249_v39, %v1255_v18  ;;  %v1276_v57 = vrot.slane %v1248_v50, %v1255_v18 }
 0x39a   : > { %v1252_v58 = vcombine.high %v1248_v50, %v1248_v50  ;;  %v1280_v60 = vrot.slane %v1250_v54, %v1255_v18 }
 0x39b   : > { %v1268_v49 = vrot.slane %v1251_v42, %v1255_v18 }
 0x39c   : > { %4399 = vmatpush3.bf16.msra.mxu0 %v4396_v63 }
 0x39f   : > { %4223 = vmatmul.mubr.msk.f32.vlgmr.msra.gmra.mrb[4].mxu0 %vm878_vm0, %v921_v62  ;;  %v1284_v62 = vrot.slane %v1252_v58, %v1255_v18 }
 0x3f6   : > { %v1620_v10 = vpop.f32.mrb[0].mxu1 }
 0x3f7   : > { %v4275_v11 = vpop.f32.mrb[1].mxu1 }
 0x462   : > { %v1020_v22 = vpop.f32.mrb[0].mxu0 }
 0x463   : > { %v1021_v23 = vadd.f32 %v3929_v20, %v1020_v22  ;;  %v4202_v25 = vpop.f32.mrb[1].mxu0 }
 0x465   : > { %v1293_v26 = vmul.f32 %v1256_v21, %v1021_v23  ;;  %v1294_v48 = vmul.f32 %v1260_v41, %v1021_v23  ;;  %v1295_v55 = vmul.f32 %v1264_v47, %v1021_v23  ;;  %v1296_v56 = vmul.f32 %v1268_v49, %v1021_v23 }
 0x466   : > { %v1297_v59 = vmul.f32 %v1272_v53, %v1021_v23  ;;  %v1298_v61 = vmul.f32 %v1276_v57, %v1021_v23  ;;  %v1299_v63 = vmul.f32 %v1280_v60, %v1021_v23  ;;  %v1300_v2 = vmul.f32 %v1284_v62, %v1021_v23 }
 0x467   : > { %4229 = vmatprep.mubr.msk.f32.mxu0 %vm1301_vm2, %v1293_v26 }
 0x46a   : > { %v4213_v29 = vpop.f32.mrb[2].mxu0 }
 0x46b   : > { %v1113_v32 = vadd.f32 %v4213_v29, %v3931_v27  ;;  %v1107_v33 = vpop.f32.mrb[3].mxu0  ;;  %v1770_v29 = vunpack.c.l.s4 %v5498_v28 }
 0x46c   : > { %v1108_v34 = vadd.f32 %v3931_v27, %v1107_v33  ;;  %v5499_v33 = vmov 1934713408  }
 0x46e   : > { %v4400_v35 = vpack.c.bf16 %v1113_v32, %v1108_v34  ;;  %v1834_v34 = vunpack.c.l.s4 %v5499_v33 }
 0x470   : > { %4402 = vmatprep.subr.msk.bf16.mxu0 %vm6261_vm3, %v4400_v35  ;;  %v1835_v39 = vunpack.c.0.s8 %v1834_v34 }
 0x471   : > { %4405 = vmatpush3.bf16.xpose.msk.msra.mxu0 %vm6261_vm3, %v4400_v35  ;;  %v1771_v35 = vunpack.c.0.s8 %v1770_v29 }
 0x472   : > { %v4224_v40 = vpop.f32.mrb[4].mxu0  ;;  %4438 = vmatprep.subr.bf16.mxu0 %v5482_v24  ;;  %v6394_v49 = vsub.s32 %v1835_v39, %v6300_v14 }
 0x473   : > { %v6310_v44 = vadd.f32 %v4224_v40, %v3934_v38  ;;  %v1193_v45 = vpop.f32.mrb[5].mxu0  ;;  %v6390_v40 = vsub.s32 %v1771_v35, %v6300_v14 }
 0x474   : > { %v6314_v51 = vadd.f32 %v3934_v38, %v1193_v45 }
 0x475   : > { %2009 = vrot.lane.b32.xlu0 %v6310_v44, %s5486_s20  ;;  %2003 = vrot.lane.b32.xlu1 %v6310_v44, %s5487_s3 }
 0x478   : > { %4230 = vmatmul.mubr.msk.f32.vlgmr.msra.gmra.mrb[6].mxu0 %vm1301_vm2, %v1294_v48 }
 0x479   : > { %2007 = vrot.lane.b32.xlu1 %v6314_v51, %s5486_s20  ;;  %2001 = vrot.lane.b32.xlu0 %v6314_v51, %s5487_s3  ;;  %s5506_s20 = smov 28   ;;  %s6913_s3 = sld [smem:[#allocation47_spill]] }
 0x47a   : > { %4232 = vmatprep.mubr.msk.f32.mxu0 %vm1301_vm2, %v1295_v55  ;;  %4441 = vmatpush3.bf16.xpose.msk.msra.mxu0 %vm6261_vm3, %v4025_v52 }
 0x47b   : > { %4442 = vmatprep.subr.bf16.mxu0 %v5482_v24 }
 0x47c   : > { %4233 = vmatmul.mubr.msk.f32.gmra.mrb[8].mxu0 %vm1301_vm2, %v1296_v56 }
 0x47d   : > { %4235 = vmatprep.mubr.msk.f32.mxu0 %vm1301_vm2, %v1297_v59 }
 0x480   : > { %4236 = vmatmul.mubr.msk.f32.gmra.mrb[10].mxu0 %vm1301_vm2, %v1298_v61 }
 0x481   : > { %4238 = vmatprep.mubr.msk.f32.mxu0 %vm1301_vm2, %v1299_v63 }
 0x482   : > { %4445 = vmatpush3.bf16.xpose.msk.msra.mxu0 %vm6261_vm3, %v4088_v1 }
 0x483   : > { %4446 = vmatprep.subr.bf16.mxu0 %v5482_v24 }
 0x484   : > { %4239 = vmatmul.mubr.msk.f32.gmra.mrb[12].mxu0 %vm1301_vm2, %v1300_v2 }
 0x485   : > { %4308 = vmatprep.mubr.msk.f32.mxu0 %vm5483_vm1, %v5484_v31 }
 0x48a   : > { %4449 = vmatpush3.bf16.xpose.msk.msra.mxu0 %vm6261_vm3, %v4089_v3 }
 0x48b   : > { %4450 = vmatprep.subr.bf16.mxu0 %v5482_v24 }
 0x492   : > { %4453 = vmatpush3.bf16.xpose.msk.msra.mxu0 %vm6261_vm3, %v4090_v4 }
 0x493   : > { %4454 = vmatprep.subr.bf16.mxu0 %v5482_v24 }
 0x49a   : > { %4457 = vmatpush3.bf16.xpose.msk.msra.mxu0 %vm6261_vm3, %v4091_v5 }
 0x49b   : > { %4458 = vmatprep.subr.bf16.mxu0 %v5482_v24 }
 0x4a2   : > { %4461 = vmatpush3.bf16.xpose.msk.msra.mxu0 %vm6261_vm3, %v4092_v6 }
 0x4a3   : > { %4462 = vmatprep.subr.bf16.mxu0 %v5482_v24 }
 0x4aa   : > { %4465 = vmatpush3.bf16.xpose.msk.msra.mxu0 %vm6261_vm3, %v4093_v7 }
 0x4ab   : > { %4466 = vmatprep.subr.bf16.mxu0 %v5482_v24 }
 0x4b2   : > { %4469 = vmatpush3.bf16.xpose.msk.msra.mxu0 %vm6261_vm3, %v4094_v8 }
 0x4b3   : > { %4470 = vmatprep.subr.bf16.mxu0 %v5482_v24 }
 0x4b9   : > { %4309 = vmatmul.mubr.msk.f32.vlgmr.msra.gmra.mrb[14].mxu0 %vm1301_vm2, %v1501_v9 }
 0x4ba   : > { %4315 = vmatprep.mubr.msk.f32.mxu0 %vm5483_vm1, %v5484_v31 }
 0x4e7   : > { %v2010_v23 = vpop.permute.xlu0 %2009  ;;  %v2004_v25 = vpop.permute.xlu1 %2003 }
 0x4e8   : > { %v2179_v50 = vcombine.low %v6310_v44, %v2010_v23  ;;  %v2180_v52 = vcombine.high %v6310_v44, %v2010_v23 }
 0x4ea   : > { %v2187_v7 = vrot.slane %v2179_v50, %v6390_v40  ;;  %v2194_v8 = vrot.slane %v2180_v52, %v6390_v40 }
 0x4eb   : > { %v2008_v26 = vpop.permute.xlu1 %2007  ;;  %v6387_v27 = vpop.permute.xlu0 %2001 }
 0x4ec   : > { %v2043_v53 = vcombine.low %v6314_v51, %v2008_v26  ;;  %v2044_v54 = vcombine.high %v6314_v51, %v2008_v26 }
 0x4ee   : > { %v2051_v9 = vrot.slane %v2043_v53, %v6390_v40 }
 0x54b   : > { %v6362_v12 = vpop.f32.mrb[6].mxu0 }
 0x54c   : > { %v6364_v13 = vpop.f32.mrb[7].mxu0 }
 0x54f   : > { %v6366_v15 = vpop.f32.mrb[8].mxu0 }
 0x550   : > { %v6368_v16 = vpop.f32.mrb[9].mxu0 }
 0x553   : > { %v6370_v0 = vpop.f32.mrb[10].mxu0 }
 0x554   : > { %v6372_v17 = vpop.f32.mrb[11].mxu0 }
 0x557   : > { %v6374_v18 = vpop.f32.mrb[12].mxu0 }
 0x558   : > { %v6376_v19 = vpop.f32.mrb[13].mxu0 }
 0x58c   : > { %v1741_v20 = vpop.f32.mrb[14].mxu0 }
 0x58d   : > { %v1742_v21 = vadd.f32 %v1741_v20, %v1620_v10  ;;  %v4310_v22 = vpop.f32.mrb[15].mxu0  ;;  %v2058_v10 = vrot.slane %v2044_v54, %v6390_v40 }
 0x58f   : > { %1749 = vrot.lane.b32.xlu1 %v1742_v21, %s5488_s17  ;;  %1746 = vrot.lane.b32.xlu0 %v1742_v21, %s5489_s14  ;;  %s3925_s17 = sshll.u32 %s6193_s28, 3 }
 0x593   : > { %1752 = vrot.lane.b32.xlu1 %v1742_v21, %s5490_s24  ;;  %1758 = vrot.lane.b32.xlu0 %v1742_v21, %s5491_s18  ;;  %s4017_s24 = sshll.u32 %s6913_s3, 1 }
 0x594   : > { %s3596_s18 = sadd.s32 %s6910_s29, %s4017_s24  ;;  %s3585_s29 = scalar_lea.sflag [#allocation4], %s6193_s28 }
 0x597   : > { %1755 = vrot.lane.b32.xlu1 %v1742_v21, %s5492_s23  ;;  %1764 = vrot.lane.b32.xlu0 %v1742_v21, %s5493_s10  ;;  %s4018_s23 = sshll.u32 %s3596_s18, 7 }
 0x59b   : > { %1761 = vrot.lane.b32.xlu1 %v1742_v21, %s5494_s16  ;;  %2015 = vrot.lane.b32.xlu0 %v6310_v44, %s5495_s26 }
 0x59f   : > { %2013 = vrot.lane.b32.xlu1 %v6314_v51, %s5495_s26  ;;  %2019 = vrot.lane.b32.xlu0 %v6314_v51, %s5489_s14 }
 0x5a3   : > { %2021 = vrot.lane.b32.xlu1 %v6310_v44, %s5489_s14  ;;  %2031 = vrot.lane.b32.xlu0 %v6314_v51, %s5496_s9  ;;  %s6914_s14 = sld [smem:[#allocation53_spill]] }
 0x5a7   : > { %2025 = vrot.lane.b32.xlu1 %v6314_v51, %s5497_s30 }
 0x5a9   : > { %p6917_p0 = scmp.ne.s32.totalorder %s6914_s14, 0 }
 0x5ab   : > { %2027 = vrot.lane.b32.xlu1 %v6310_v44, %s5497_s30  ;;  %s6915_s30 = sld [smem:[#allocation70_spill]] }
 0x5af   : > { %2033 = vrot.lane.b32.xlu1 %v6310_v44, %s5496_s9 }
 0x601   : > { %v1750_v30 = vpop.permute.xlu1 %1749  ;;  %v1747_v32 = vpop.permute.xlu0 %1746 }
 0x602   : > { %v1767_v41 = vcombine.low %v1742_v21, %v1750_v30  ;;  %v1768_v42 = vcombine.high %v1742_v21, %v1750_v30 }
 0x604   : > { %v1775_v55 = vrot.slane %v1767_v41, %v6390_v40  ;;  %v6402_v56 = vrot.slane %v1768_v42, %v6390_v40 }
 0x605   : > { %v1753_v36 = vpop.permute.xlu1 %1752  ;;  %v1759_v37 = vpop.permute.xlu0 %1758 }
 0x606   : > { %v1783_v38 = vcombine.low %v1747_v32, %v1753_v36  ;;  %v1784_v46 = vcombine.high %v1747_v32, %v1753_v36 }
 0x608   : > { %v1791_v47 = vrot.slane %v1783_v38, %v6390_v40  ;;  %v6405_v59 = vrot.slane %v1784_v46, %v6390_v40 }
 0x609   : > { %v1756_v43 = vpop.permute.xlu1 %1755  ;;  %v1765_v45 = vpop.permute.xlu0 %1764 }
 0x60a   : > { %v1815_v48 = vcombine.low %v1759_v37, %v1765_v45  ;;  %v1831_v62 = vcombine.low %v1775_v55, %v1791_v47  ;;  %v1832_v63 = vcombine.high %v1775_v55, %v1791_v47  ;;  %v1816_v1 = vcombine.high %v1759_v37, %v1765_v45 }
 0x60b   : > { %v1847_v11 = vcombine.low %v6402_v56, %v6405_v59  ;;  %v1848_v20 = vcombine.high %v6402_v56, %v6405_v59 }
 0x60c   : > { %v1823_v2 = vrot.slane %v1815_v48, %v6390_v40  ;;  %v6420_v30 = vrot.slane %v1831_v62, %v6394_v49  ;;  %v1846_v32 = vrot.slane %v1832_v63, %v6394_v49  ;;  %v1830_v33 = vrot.slane %v1816_v1, %v6390_v40 }
 0x60d   : > { %v1762_v57 = vpop.permute.xlu1 %1761  ;;  %v2016_v58 = vpop.permute.xlu0 %2015  ;;  %v1855_v50 = vrot.slane %v1847_v11, %v6394_v49 }
 0x60e   : > { %v1799_v14 = vcombine.low %v1756_v43, %v1762_v57  ;;  %v2195_v60 = vcombine.low %v2004_v25, %v2016_v58  ;;  %v2196_v61 = vcombine.high %v2004_v25, %v2016_v58  ;;  %v1800_v3 = vcombine.high %v1756_v43, %v1762_v57 }
 0x610   : > { %v1807_v4 = vrot.slane %v1799_v14, %v6390_v40  ;;  %v2203_v5 = vrot.slane %v2195_v60, %v6390_v40  ;;  %v2210_v6 = vrot.slane %v2196_v61, %v6390_v40  ;;  %v1814_v34 = vrot.slane %v1800_v3, %v6390_v40 }
 0x611   : > { %v2014_v29 = vpop.permute.xlu1 %2013 }
 0x612   : > { %v1863_v21 = vcombine.low %v1807_v4, %v1823_v2  ;;  %v1864_v22 = vcombine.high %v1807_v4, %v1823_v2  ;;  %v2243_v23 = vcombine.low %v2187_v7, %v2203_v5  ;;  %v2244_v25 = vcombine.high %v2187_v7, %v2203_v5 }
 0x613   : > { %v2259_v26 = vcombine.low %v2194_v8, %v2210_v6  ;;  %v2260_v28 = vcombine.high %v2194_v8, %v2210_v6  ;;  %v2059_v42 = vcombine.low %v6387_v27, %v2014_v29  ;;  %v2060_v43 = vcombine.high %v6387_v27, %v2014_v29  ;;  %v6458_v8 = vld [vmem:[%s755_s12] ss:$0 sm:$0xff]  ;;  %s5503_s12 = smov 12  }
 0x614   : > { %v2251_v35 = vrot.slane %v2243_v23, %v6394_v49  ;;  %v2258_v36 = vrot.slane %v2244_v25, %v6394_v49  ;;  %v6430_v39 = vrot.slane %v1863_v21, %v6394_v49  ;;  %v1878_v41 = vrot.slane %v1864_v22, %v6394_v49 }
 0x615   : > { %v2267_v37 = vrot.slane %v2259_v26, %v6394_v49  ;;  %v2274_v38 = vrot.slane %v2260_v28, %v6394_v49  ;;  %v1879_v52 = vcombine.low %v1814_v34, %v1830_v33  ;;  %v2067_v53 = vrot.slane %v2059_v42, %v6390_v40 }
 0x616   : > { %v3990_v45 = vcombine.low %v2251_v35, %v2258_v36  ;;  %v3992_v46 = vcombine.high %v2251_v35, %v2258_v36  ;;  %v2074_v54 = vrot.slane %v2060_v43, %v6390_v40  ;;  %v1880_v55 = vcombine.high %v1814_v34, %v1830_v33 }
 0x617   : > { %v3994_v47 = vcombine.low %v2267_v37, %v2274_v38  ;;  %v3996_v48 = vcombine.high %v2267_v37, %v2274_v38  ;;  %v2107_v14 = vcombine.low %v2051_v9, %v2067_v53  ;;  %v2108_v60 = vcombine.high %v2051_v9, %v2067_v53 }
 0x618   : > { %v6439_v57 = vrot.slane %v3990_v45, %v6390_v40  ;;  %v6442_v58 = vrot.slane %v3992_v46, %v6390_v40  ;;  %v2123_v61 = vcombine.low %v2058_v10, %v2074_v54  ;;  %v2124_v62 = vcombine.high %v2058_v10, %v2074_v54 }
 0x619   : > { %v6445_v27 = vrot.slane %v3994_v47, %v6390_v40  ;;  %v6448_v63 = vrot.slane %v3996_v48, %v6390_v40  ;;  %v1897_v1 = vcombine.low %v1846_v32, %v1878_v41  ;;  %v1896_v2 = vcombine.high %v6420_v30, %v6430_v39 }
 0x61a   : > { %v1898_v3 = vcombine.high %v1846_v32, %v1878_v41  ;;  %v2115_v4 = vrot.slane %v2107_v14, %v6394_v49  ;;  %v2122_v5 = vrot.slane %v2108_v60, %v6394_v49  ;;  %v2131_v6 = vrot.slane %v2123_v61, %v6394_v49 }
 0x61b   : > { %v2138_v7 = vrot.slane %v2124_v62, %v6394_v49  ;;  %v1887_v9 = vrot.slane %v1879_v52, %v6394_v49  ;;  %v1905_v10 = vadd.f32 %v1897_v1, %v6368_v16  ;;  %v1904_v11 = vadd.f32 %v6362_v12, %v1896_v2 }
 0x61c   : > { %v1906_v21 = vadd.f32 %v6366_v15, %v1898_v3  ;;  %v3982_v22 = vcombine.low %v2115_v4, %v2122_v5  ;;  %v3984_v23 = vcombine.high %v2115_v4, %v2122_v5  ;;  %v2515_v32 = vcombine.low %v6439_v57, %v6442_v58 }
 0x61d   : > { %v3986_v25 = vcombine.low %v2131_v6, %v2138_v7  ;;  %v3988_v26 = vcombine.high %v2131_v6, %v2138_v7  ;;  %v6465_v28 = vadd.f32 %v6458_v8, %v1905_v10  ;;  %v6468_v29 = vadd.f32 %v6458_v8, %v1904_v11 }
 0x61e   : > { %v2547_v16 = vcombine.low %v6445_v27, %v6448_v63  ;;  %v2323_v12 = vrot.slane %v3982_v22, %v6390_v40  ;;  %v2339_v15 = vrot.slane %v3984_v23, %v6390_v40  ;;  %v1894_v35 = vrot.slane %v1880_v55, %v6394_v49 }
 0x61f   : > { %v2355_v33 = vrot.slane %v3986_v25, %v6390_v40  ;;  %v2371_v34 = vrot.slane %v3988_v26, %v6390_v40  ;;  %v1933_v36 = vsel %vm1926_vm4, %v6465_v28, -inf  ;;  %v1930_v37 = vsel %vm1926_vm4, %v6468_v29, -inf }
 0x620   : > { %v6484_v38 = vadd.f32 %v6458_v8, %v1906_v21  ;;  %v1862_v41 = vrot.slane %v1848_v20, %v6394_v49  ;;  %1934 = vmax.xlane.f32.xlu0 %v1933_v36  ;;  %1931 = vmax.xlane.f32.xlu1 %v1930_v37  ;;  %v2379_v42 = vcombine.low %v2323_v12, %v2339_v15 }
 0x621   : > { %v2411_v43 = vcombine.low %v2355_v33, %v2371_v34  ;;  %v2523_v45 = vrot.slane %v2515_v32, %v6394_v49  ;;  %v2555_v46 = vrot.slane %v2547_v16, %v6394_v49  ;;  %v1899_v47 = vcombine.low %v1855_v50, %v1887_v9  ;;  %v2022_v16 = vpop.permute.xlu1 %2021 }
 0x622   : > { %v2387_v48 = vrot.slane %v2379_v42, %v6394_v49  ;;  %v1900_v52 = vcombine.high %v1855_v50, %v1887_v9  ;;  %v1936_v53 = vsel %vm1926_vm4, %v6484_v38, -inf  ;;  %v1901_v59 = vcombine.low %v1862_v41, %v1894_v35 }
 0x623   : > { %v2419_v54 = vrot.slane %v2411_v43, %v6394_v49  ;;  %v1907_v56 = vadd.f32 %v1899_v47, %v6372_v17  ;;  %v1902_v55 = vcombine.high %v1862_v41, %v1894_v35  ;;  %v2380_v14 = vcombine.high %v2323_v12, %v2339_v15  ;;  %v2020_v15 = vpop.permute.xlu0 %2019 }
 0x624   : > { %1937 = vmax.xlane.f32.xlu1 %v1936_v53  ;;  %v1908_v20 = vadd.f32 %v6370_v0, %v1900_v52  ;;  %v2412_v60 = vcombine.high %v2355_v33, %v2371_v34  ;;  %v2579_v62 = vcombine.low %v2523_v45, %v2555_v46  ;;  %v2580_v2 = vcombine.high %v2523_v45, %v2555_v46 }
 0x625   : > { %v2443_v61 = vcombine.low %v2387_v48, %v2419_v54  ;;  %v2444_v1 = vcombine.high %v2387_v48, %v2419_v54  ;;  %v1909_v50 = vadd.f32 %v1901_v59, %v6376_v19  ;;  %v1910_v3 = vadd.f32 %v6374_v18, %v1902_v55  ;;  %v2026_v12 = vpop.permute.xlu1 %2025 }
 0x626   : > { %v2394_v4 = vrot.slane %v2380_v14, %v6394_v49  ;;  %v2426_v0 = vrot.slane %v2412_v60, %v6394_v49  ;;  %v2516_v7 = vcombine.high %v6439_v57, %v6442_v58  ;;  %v2548_v9 = vcombine.high %v6445_v27, %v6448_v63 }
 0x627   : > { %v4471_v5 = vpack.c.bf16 %v2579_v62, %v2443_v61  ;;  %v4474_v6 = vpack.c.bf16 %v2580_v2, %v2444_v1  ;;  %v6502_v17 = vadd.f32 %v6458_v8, %v1910_v3  ;;  %v1895_v57 = vcombine.low %v6420_v30, %v6430_v39  ;;  %v2032_v34 = vpop.permute.xlu0 %2031 }
 0x628   : > { %v2445_v18 = vcombine.low %v2394_v4, %v2426_v0  ;;  %v2446_v19 = vcombine.high %v2394_v4, %v2426_v0  ;;  %v2530_v10 = vrot.slane %v2516_v7, %v6394_v49  ;;  %v2562_v11 = vrot.slane %v2548_v9, %v6394_v49 }
 0x629   : > { %4472 = vmatpush3.bf16.msra.mxu0 %v4471_v5  ;;  %4475 = vmatpush3.bf16.msra.mxu1 %v4474_v6  ;;  %v6521_v58 = vadd.f32 %v6458_v8, %v1907_v56  ;;  %v1903_v27 = vadd.f32 %v1895_v57, %v6364_v13  ;;  %v6527_v26 = vadd.f32 %v6458_v8, %v1908_v20  ;;  %v1948_v39 = vsel %vm1926_vm4, %v6502_v17, -inf  ;;  %v2028_v33 = vpop.permute.xlu1 %2027 }
 0x62a   : > { %4476 = vmatprep.subr.bf16.mxu1 %v5482_v24  ;;  %v2581_v21 = vcombine.low %v2530_v10, %v2562_v11  ;;  %v2582_v22 = vcombine.high %v2530_v10, %v2562_v11  ;;  %v6537_v30 = vadd.f32 %v6458_v8, %v1909_v50  ;;  %v2075_v42 = vcombine.low %v2020_v15, %v2032_v34 }
 0x62b   : > { %v1939_v63 = vsel %vm1926_vm4, %v6521_v58, -inf  ;;  %v6530_v32 = vadd.f32 %v6458_v8, %v1903_v27  ;;  %v2076_v43 = vcombine.high %v2020_v15, %v2032_v34 }
 0x62c   : > { %v6512_v23 = vpack.c.bf16 %v2581_v21, %v2445_v18  ;;  %v6514_v25 = vpack.c.bf16 %v2582_v22, %v2446_v19  ;;  %v1945_v13 = vsel %vm1926_vm4, %v6537_v30, -inf  ;;  %v2083_v56 = vrot.slane %v2075_v42, %v6390_v40 }
 0x62d   : > { %v2034_v35 = vpop.permute.xlu1 %2033  ;;  %v2090_v59 = vrot.slane %v2076_v43, %v6390_v40 }
 0x62e   : > { %v2211_v20 = vcombine.low %v2022_v16, %v2034_v35  ;;  %v2212_v55 = vcombine.high %v2022_v16, %v2034_v35 }
 0x630   : > { %v2219_v6 = vrot.slane %v2211_v20, %v6390_v40  ;;  %v2226_v18 = vrot.slane %v2212_v55, %v6390_v40 }
 0x635   : > { %2039 = vrot.lane.b32.xlu1 %v6310_v44, %s5500_s21  ;;  %v1942_v44 = vsel %vm1926_vm4, %v6527_v26, -inf }
 0x636   : > { %2037 = vrot.lane.b32.xlu0 %v6314_v51, %s5500_s21  ;;  %v1927_v51 = vsel %vm1926_vm4, %v6530_v32, -inf  ;;  %s6916_s21 = smov %s6915_s30 }
 0x655   : > { %1940 = vmax.xlane.f32.xlu0 %v1939_v63 }
 0x659   : > { %1943 = vmax.xlane.f32.xlu0 %v1942_v44  ;;  %1928 = vmax.xlane.f32.xlu1 %v1927_v51 }
 0x65d   : > { %1946 = vmax.xlane.f32.xlu0 %v1945_v13 }
 0x661   : > { %1949 = vmax.xlane.f32.xlu0 %v1948_v39 }
 0x6ad   : > { %v1932_v36 = vpop.xlane.xlu1 %1931  ;;  %v1935_v37 = vpop.xlane.xlu0 %1934 }
 0x6ae   : > { %v1952_v8 = vsub.f32 %v6468_v29, %v1932_v36  ;;  %v1953_v41 = vsub.f32 %v6465_v28, %v1935_v37 }
 0x6b0   : > { %v1961_v45 = vmul.f32 1.442695, %v1952_v8  ;;  %v1963_v46 = vmul.f32 1.442695, %v1953_v41 }
 0x6b1   : > { %v1938_v47 = vpop.xlane.xlu1 %1937  ;;  %v2038_v48 = vpop.permute.xlu0 %2037 }
 0x6b2   : > { %4785 = vpow2.f32 %v1961_v45  ;;  %v1954_v52 = vsub.f32 %v6484_v38, %v1938_v47  ;;  %v2091_v53 = vcombine.low %v2026_v12, %v2038_v48  ;;  %v2092_v54 = vcombine.high %v2026_v12, %v2038_v48 }
 0x6b3   : > { %4787 = vpow2.f32 %v1963_v46 }
 0x6b4   : > { %v2099_v29 = vrot.slane %v2091_v53, %v6390_v40  ;;  %v2106_v28 = vrot.slane %v2092_v54, %v6390_v40  ;;  %v1965_v60 = vmul.f32 1.442695, %v1954_v52 }
 0x6b5   : > { %v2040_v14 = vpop.permute.xlu1 %2039 }
 0x6b6   : > { %v2139_v61 = vcombine.low %v2083_v56, %v2099_v29  ;;  %v2140_v62 = vcombine.high %v2083_v56, %v2099_v29  ;;  %v2155_v1 = vcombine.low %v2090_v59, %v2106_v28  ;;  %v2156_v2 = vcombine.high %v2090_v59, %v2106_v28 }
 0x6b7   : > { %v2227_v38 = vcombine.low %v2028_v33, %v2040_v14  ;;  %v2228_v50 = vcombine.high %v2028_v33, %v2040_v14  ;;  %4789 = vpow2.f32 %v1965_v60 }
 0x6b8   : > { %v2147_v3 = vrot.slane %v2139_v61, %v6394_v49  ;;  %v2154_v4 = vrot.slane %v2140_v62, %v6394_v49  ;;  %v2163_v5 = vrot.slane %v2155_v1, %v6394_v49  ;;  %v2170_v0 = vrot.slane %v2156_v2, %v6394_v49 }
 0x6b9   : > { %v2235_v7 = vrot.slane %v2227_v38, %v6390_v40  ;;  %v2242_v9 = vrot.slane %v2228_v50, %v6390_v40 }
 0x6ba   : > { %v3983_v19 = vcombine.low %v2147_v3, %v2154_v4  ;;  %v3985_v10 = vcombine.high %v2147_v3, %v2154_v4  ;;  %v3987_v11 = vcombine.low %v2163_v5, %v2170_v0  ;;  %v3989_v21 = vcombine.high %v2163_v5, %v2170_v0 }
 0x6bb   : > { %v2275_v22 = vcombine.low %v2219_v6, %v2235_v7  ;;  %v2276_v57 = vcombine.high %v2219_v6, %v2235_v7  ;;  %v2291_v51 = vcombine.low %v2226_v18, %v2242_v9  ;;  %v2292_v13 = vcombine.high %v2226_v18, %v2242_v9 }
 0x6bc   : > { %v6558_v27 = vpop.eup %4785  ;;  %v6561_v63 = vrot.slane %v3983_v19, %v6390_v40  ;;  %v6564_v44 = vrot.slane %v3985_v10, %v6390_v40  ;;  %v6567_v16 = vrot.slane %v3987_v11, %v6390_v40  ;;  %v6570_v12 = vrot.slane %v3989_v21, %v6390_v40 }
 0x6bd   : > { %v4788_v39 = vpop.eup %4787  ;;  %v2283_v15 = vrot.slane %v2275_v22, %v6394_v49  ;;  %v2290_v33 = vrot.slane %v2276_v57, %v6394_v49  ;;  %4323 = vmatmul.mubr.msk.f32.vlgmr.msra.gmra.mrb[2].mxu1 %vm1926_vm4, %v6558_v27  ;;  %v2299_v34 = vrot.slane %v2291_v51, %v6394_v49  ;;  %v2306_v35 = vrot.slane %v2292_v13, %v6394_v49 }
 0x6be   : > { %4478 = vmatpush3.bf16.msra.mxu1 %v6512_v23  ;;  %v1981_v36 = vsel %vm1926_vm4, %v4788_v39, 0.0  ;;  %4329 = vmatprep.mubr.msk.f32.mxu1 %vm5483_vm1, %v5484_v31  ;;  %v2395_v43 = vcombine.low %v6561_v63, %v6564_v44  ;;  %v2427_v45 = vcombine.low %v6567_v16, %v6570_v12  ;;  %v2428_v7 = vcombine.high %v6567_v16, %v6570_v12 }
 0x6bf   : > { %v3991_v37 = vcombine.low %v2283_v15, %v2290_v33  ;;  %v3993_v8 = vcombine.high %v2283_v15, %v2290_v33  ;;  %1982 = vadd.xlane.f32.xlu1 %v1981_v36  ;;  %4479 = vmatprep.subr.bf16.mxu1 %v5482_v24  ;;  %v3995_v41 = vcombine.low %v2299_v34, %v2306_v35  ;;  %v1978_v36 = vsel %vm1926_vm4, %v6558_v27, 0.0 }
 0x6c0   : > { %v3997_v42 = vcombine.high %v2299_v34, %v2306_v35  ;;  %v2403_v54 = vrot.slane %v2395_v43, %v6394_v49  ;;  %v2435_v56 = vrot.slane %v2427_v45, %v6394_v49  ;;  %v2442_v21 = vrot.slane %v2428_v7, %v6394_v49 }
 0x6c1   : > { %v2466_v23 = vrot.slane %v3991_v37, %v6390_v40  ;;  %v2482_v46 = vrot.slane %v3993_v8, %v6390_v40  ;;  %4330 = vmatmul.mubr.msk.f32.vlgmr.msra.gmra.mrb[4].mxu1 %vm1926_vm4, %v4788_v39  ;;  %v2498_v47 = vrot.slane %v3995_v41, %v6390_v40  ;;  %v6596_v53 = vpop.eup %4789 }
 0x6c2   : > { %v2514_v48 = vrot.slane %v3997_v42, %v6390_v40  ;;  %4481 = vmatpush3.bf16.msra.mxu1 %v6514_v25  ;;  %4336 = vmatprep.mubr.msk.f32.mxu1 %vm5483_vm1, %v5484_v31  ;;  %v2447_v28 = vcombine.low %v2403_v54, %v2435_v56  ;;  %v2448_v11 = vcombine.high %v2403_v54, %v2435_v56  ;;  %v1984_v41 = vsel %vm1926_vm4, %v6596_v53, 0.0 }
 0x6c3   : > { %4482 = vmatprep.subr.bf16.mxu1 %v5482_v24  ;;  %v2531_v52 = vcombine.low %v2466_v23, %v2482_v46  ;;  %v2532_v5 = vcombine.high %v2466_v23, %v2482_v46 }
 0x6c4   : > { %v2563_v59 = vcombine.low %v2498_v47, %v2514_v48  ;;  %v2564_v6 = vcombine.high %v2498_v47, %v2514_v48 }
 0x6c5   : > { %4337 = vmatmul.mubr.msk.f32.vlgmr.msra.gmra.mrb[6].mxu1 %vm1926_vm4, %v6596_v53  ;;  %v2539_v29 = vrot.slane %v2531_v52, %v6394_v49 }
 0x6c6   : > { %v2571_v25 = vrot.slane %v2563_v59, %v6394_v49  ;;  %4343 = vmatprep.mubr.msk.f32.mxu1 %vm5483_vm1, %v5484_v31  ;;  %v2578_v19 = vrot.slane %v2564_v6, %v6394_v49 }
 0x6c8   : > { %v2583_v20 = vcombine.low %v2539_v29, %v2571_v25  ;;  %v2584_v18 = vcombine.high %v2539_v29, %v2571_v25 }
 0x6ca   : > { %v4483_v55 = vpack.c.bf16 %v2583_v20, %v2447_v28 }
 0x6cc   : > { %4484 = vmatpush3.bf16.msra.mxu1 %v4483_v55 }
 0x6cd   : > { %4485 = vmatprep.subr.bf16.mxu1 %v5482_v24 }
 0x6e2   : > { %v1941_v14 = vpop.xlane.xlu0 %1940 }
 0x6e3   : > { %v1955_v60 = vsub.f32 %v6521_v58, %v1941_v14  ;;  %v2396_v58 = vcombine.high %v6561_v63, %v6564_v44  ;;  %v4486_v63 = vpack.c.bf16 %v2584_v18, %v2448_v11 }
 0x6e5   : > { %v1967_v61 = vmul.f32 1.442695, %v1955_v60 }
 0x6e6   : > { %v1929_v62 = vpop.xlane.xlu1 %1928  ;;  %v1944_v1 = vpop.xlane.xlu0 %1943 }
 0x6e7   : > { %4791 = vpow2.f32 %v1967_v61  ;;  %v1951_v2 = vsub.f32 %v6530_v32, %v1929_v62  ;;  %v1956_v38 = vsub.f32 %v6527_v26, %v1944_v1  ;;  %v2546_v26 = vrot.slane %v2532_v5, %v6394_v49 }
 0x6e9   : > { %v1959_v50 = vmul.f32 1.442695, %v1951_v2  ;;  %v1969_v3 = vmul.f32 1.442695, %v1956_v38  ;;  %v2585_v51 = vcombine.low %v2546_v26, %v2578_v19  ;;  %v2586_v15 = vcombine.high %v2546_v26, %v2578_v19 }
 0x6ea   : > { %v1947_v4 = vpop.xlane.xlu0 %1946 }
 0x6eb   : > { %4793 = vpow2.f32 %v1959_v50  ;;  %v1957_v0 = vsub.f32 %v6537_v30, %v1947_v4  ;;  %v2410_v30 = vrot.slane %v2396_v58, %v6394_v49 }
 0x6ec   : > { %4795 = vpow2.f32 %v1969_v3 }
 0x6ed   : > { %v1971_v9 = vmul.f32 1.442695, %v1957_v0  ;;  %v2450_v33 = vcombine.high %v2410_v30, %v2442_v21 }
 0x6ee   : > { %v1950_v32 = vpop.xlane.xlu0 %1949 }
 0x6ef   : > { %4797 = vpow2.f32 %v1971_v9  ;;  %v1958_v10 = vsub.f32 %v6502_v17, %v1950_v32  ;;  %v2449_v17 = vcombine.low %v2410_v30, %v2442_v21  ;;  %v4492_v35 = vpack.c.bf16 %v2586_v15, %v2450_v33 }
 0x6f1   : > { %v4792_v22 = vpop.eup %4791  ;;  %v1973_v57 = vmul.f32 1.442695, %v1958_v10  ;;  %v4489_v16 = vpack.c.bf16 %v2585_v51, %v2449_v17 }
 0x6f2   : > { %4344 = vmatmul.mubr.msk.f32.vlgmr.msra.gmra.mrb[8].mxu1 %vm1926_vm4, %v4792_v22  ;;  %v1987_v44 = vsel %vm1926_vm4, %v4792_v22, 0.0 }
 0x6f3   : > { %4799 = vpow2.f32 %v1973_v57  ;;  %4487 = vmatpush3.bf16.msra.mxu1 %v4486_v63  ;;  %1988 = vadd.xlane.f32.xlu1 %v1987_v44 }
 0x6f4   : > { %4350 = vmatprep.mubr.msk.f32.mxu1 %vm5483_vm1, %v5484_v31  ;;  %4488 = vmatprep.subr.bf16.mxu1 %v5482_v24 }
 0x6f5   : > { %v4794_v13 = vpop.eup %4793 }
 0x6f6   : > { %v4796_v39 = vpop.eup %4795  ;;  %4316 = vmatmul.mubr.msk.f32.vlgmr.msra.gmra.mrb[16].mxu0 %vm1926_vm4, %v4794_v13  ;;  %v1975_v12 = vsel %vm1926_vm4, %v4794_v13, 0.0 }
 0x6f7   : > { %4351 = vmatmul.mubr.msk.f32.vlgmr.msra.gmra.mrb[10].mxu1 %vm1926_vm4, %v4796_v39  ;;  %1976 = vadd.xlane.f32.xlu0 %v1975_v12  ;;  %v1990_v27 = vsel %vm1926_vm4, %v4796_v39, 0.0 }
 0x6f8   : > { %4490 = vmatpush3.bf16.msra.mxu1 %v4489_v16  ;;  %4357 = vmatprep.mubr.msk.f32.mxu1 %vm5483_vm1, %v5484_v31 }
 0x6f9   : > { %v4798_v34 = vpop.eup %4797  ;;  %4491 = vmatprep.subr.bf16.mxu1 %v5482_v24 }
 0x6fa   : > { %v1993_v37 = vsel %vm1926_vm4, %v4798_v34, 0.0 }
 0x6fb   : > { %4358 = vmatmul.mubr.msk.f32.vlgmr.msra.gmra.mrb[12].mxu1 %vm1926_vm4, %v4798_v34  ;;  %1979 = vadd.xlane.f32.xlu0 %v1978_v36 }
 0x6fc   : > { %4493 = vmatpush3.bf16.msra.mxu1 %v4492_v35  ;;  %1994 = vadd.xlane.f32.xlu1 %v1993_v37 }
 0x6fd   : > { %v4800_v8 = vpop.eup %4799  ;;  %4364 = vmatprep.mubr.msk.f32.mxu1 %vm5483_vm1, %v5484_v31  ;;  %4494 = vmatprep.subr.bf16.mxu1 %v5482_v24 }
 0x6fe   : > { %v1996_v42 = vsel %vm1926_vm4, %v4800_v8, 0.0 }
 0x6ff   : > { %4365 = vmatmul.mubr.msk.f32.vlgmr.msra.gmra.mrb[14].mxu1 %vm1926_vm4, %v4800_v8  ;;  %1985 = vadd.xlane.f32.xlu0 %v1984_v41 }
 0x700   : > { %4375 = vmatprep.mubr.msk.f32.mxu1 %vm5483_vm1, %v5484_v31 }
 0x703   : > { %1991 = vadd.xlane.f32.xlu0 %v1990_v27 }
 0x707   : > { %1997 = vadd.xlane.f32.xlu0 %v1996_v42 }
 0x74c   : > { %v1983_v20 = vpop.xlane.xlu1 %1982 }
 0x780   : > { %v1989_v55 = vpop.xlane.xlu1 %1988 }
 0x784   : > { %v1977_v43 = vpop.xlane.xlu0 %1976 }
 0x788   : > { %v1980_v45 = vpop.xlane.xlu0 %1979 }
 0x789   : > { %4801 = vrcp.f32 %v1980_v45  ;;  %v1995_v60 = vpop.xlane.xlu1 %1994 }
 0x78c   : > { %v1986_v23 = vpop.xlane.xlu0 %1985 }
 0x78d   : > { %4803 = vrcp.f32 %v1986_v23 }
 0x78e   : > { %4805 = vrcp.f32 %v1983_v20 }
 0x78f   : > { %4807 = vrcp.f32 %v1977_v43 }
 0x790   : > { %v2729_v46 = vpop.f32.mrb[2].mxu1  ;;  %v1992_v14 = vpop.xlane.xlu0 %1991  ;;  %4809 = vrcp.f32 %v1989_v55 }
 0x791   : > { %v4324_v47 = vpop.f32.mrb[3].mxu1  ;;  %4811 = vrcp.f32 %v1995_v60 }
 0x792   : > { %4813 = vrcp.f32 %v1992_v14 }
 0x793   : > { %v4802_v53 = vpop.eup %4801 }
 0x794   : > { %v2802_v48 = vpop.f32.mrb[4].mxu1  ;;  %v3180_v59 = vmul.f32 %v4802_v53, %v2729_v46  ;;  %v1998_v61 = vpop.xlane.xlu0 %1997 }
 0x795   : > { %v4331_v52 = vpop.f32.mrb[5].mxu1  ;;  %4815 = vrcp.f32 %v1998_v61 }
 0x797   : > { %v4804_v54 = vpop.eup %4803 }
 0x798   : > { %v2875_v56 = vpop.f32.mrb[6].mxu1  ;;  %v4806_v2 = vpop.eup %4805 }
 0x799   : > { %v3182_v31 = vmul.f32 %v4804_v54, %v2875_v56  ;;  %v4338_v29 = vpop.f32.mrb[7].mxu1  ;;  %v4808_v38 = vpop.eup %4807  ;;  %v3181_v3 = vmul.f32 %v4806_v2, %v2802_v48 }
 0x79a   : > { %v4810_v9 = vpop.eup %4809 }
 0x79b   : > { %v3203_v25 = vcombine.low %v3180_v59, %v3182_v31  ;;  %v3204_v28 = vcombine.high %v3180_v59, %v3182_v31  ;;  %v4812_v18 = vpop.eup %4811 }
 0x79c   : > { %v4814_v17 = vpop.eup %4813 }
 0x79d   : > { %v3211_v32 = vrot.slane %v3203_v25, %v6390_v40  ;;  %v3218_v26 = vrot.slane %v3204_v28, %v6390_v40 }
 0x79f   : > { %v4816_v16 = vpop.eup %4815 }
 0x7c5   : > { %v2948_v62 = vpop.f32.mrb[8].mxu1 }
 0x7c6   : > { %v4345_v1 = vpop.f32.mrb[9].mxu1  ;;  %v3183_v30 = vmul.f32 %v4810_v9, %v2948_v62 }
 0x7c9   : > { %v2656_v50 = vpop.f32.mrb[16].mxu0 }
 0x7ca   : > { %v3179_v4 = vmul.f32 %v4808_v38, %v2656_v50  ;;  %v3021_v5 = vpop.f32.mrb[10].mxu1  ;;  %v4317_v6 = vpop.f32.mrb[17].mxu0 }
 0x7cb   : > { %v4352_v0 = vpop.f32.mrb[11].mxu1  ;;  %v3184_v36 = vmul.f32 %v4814_v17, %v3021_v5  ;;  %v3499_v5 = vld [vmem:[#allocation26] sm:$0xff]  ;;  %v3500_v6 = vld [vmem:[#allocation26 + $0x8] sm:$0xff] }
 0x7cc   : > { %v3187_v58 = vcombine.low %v3179_v4, %v3181_v3  ;;  %v3188_v7 = vcombine.high %v3179_v4, %v3181_v3 }
 0x7ce   : > { %v3195_v19 = vrot.slane %v3187_v58, %v6390_v40  ;;  %v3202_v10 = vrot.slane %v3188_v7, %v6390_v40  ;;  %v3094_v11 = vpop.f32.mrb[12].mxu1 }
 0x7cf   : > { %v3185_v21 = vmul.f32 %v4812_v18, %v3094_v11  ;;  %v4359_v22 = vpop.f32.mrb[13].mxu1  ;;  %v3501_v11 = vld [vmem:[#allocation26 + $0x10] sm:$0xff] }
 0x7d0   : > { %v3251_v57 = vcombine.low %v3195_v19, %v3211_v32  ;;  %v3252_v63 = vcombine.high %v3195_v19, %v3211_v32  ;;  %v3267_v44 = vcombine.low %v3202_v10, %v3218_v26  ;;  %v3268_v51 = vcombine.high %v3202_v10, %v3218_v26 }
 0x7d1   : > { %v3219_v13 = vcombine.low %v3183_v30, %v3185_v21  ;;  %v3220_v39 = vcombine.high %v3183_v30, %v3185_v21  ;;  %v4495_v10 = vpack.c.bf16 %v3500_v6, %v3499_v5  ;;  %v3502_v30 = vld [vmem:[#allocation26 + $0x18] sm:$0xff] }
 0x7d2   : > { %v3259_v12 = vrot.slane %v3251_v57, %v6394_v49  ;;  %v3266_v15 = vrot.slane %v3252_v63, %v6394_v49  ;;  %v3275_v33 = vrot.slane %v3267_v44, %v6394_v49  ;;  %v3282_v34 = vrot.slane %v3268_v51, %v6394_v49  ;;  %v3167_v35 = vpop.f32.mrb[14].mxu1 }
 0x7d3   : > { %v3186_v37 = vmul.f32 %v4816_v16, %v3167_v35  ;;  %v4366_v8 = vpop.f32.mrb[15].mxu1  ;;  %v3227_v53 = vrot.slane %v3219_v13, %v6390_v40  ;;  %v3234_v54 = vrot.slane %v3220_v39, %v6390_v40  ;;  %4496 = vmatpush3.bf16.msra.mxu1 %v4495_v10  ;;  %v4498_v44 = vpack.c.bf16 %v3502_v30, %v3501_v11 }
 0x7d4   : > { %v4006_v41 = vcombine.low %v3259_v12, %v3266_v15  ;;  %v4008_v27 = vcombine.high %v3259_v12, %v3266_v15  ;;  %v4010_v42 = vcombine.low %v3275_v33, %v3282_v34  ;;  %v4012_v43 = vcombine.high %v3275_v33, %v3282_v34  ;;  %4497 = vmatprep.subr.bf16.mxu1 %v5482_v24 }
 0x7d5   : > { %v3235_v45 = vcombine.low %v3184_v36, %v3186_v37  ;;  %v3236_v23 = vcombine.high %v3184_v36, %v3186_v37 }
 0x7d6   : > { %v3331_v46 = vrot.slane %v4006_v41, %v6390_v40  ;;  %v3347_v47 = vrot.slane %v4008_v27, %v6390_v40  ;;  %v3363_v48 = vrot.slane %v4010_v42, %v6390_v40  ;;  %v3379_v52 = vrot.slane %v4012_v43, %v6390_v40 }
 0x7d7   : > { %v3243_v56 = vrot.slane %v3235_v45, %v6390_v40  ;;  %v3250_v59 = vrot.slane %v3236_v23, %v6390_v40  ;;  %4499 = vmatpush3.bf16.msra.mxu1 %v4498_v44 }
 0x7d8   : > { %v3388_v31 = vcombine.high %v3331_v46, %v3347_v47  ;;  %v3420_v29 = vcombine.high %v3363_v48, %v3379_v52  ;;  %v3387_v25 = vcombine.low %v3331_v46, %v3347_v47  ;;  %v3419_v28 = vcombine.low %v3363_v48, %v3379_v52 }
 0x7d9   : > { %v3283_v20 = vcombine.low %v3227_v53, %v3243_v56  ;;  %v3284_v55 = vcombine.high %v3227_v53, %v3243_v56  ;;  %v3299_v14 = vcombine.low %v3234_v54, %v3250_v59  ;;  %v3300_v60 = vcombine.high %v3234_v54, %v3250_v59  ;;  %v4014_v53 = vld [vmem:[#allocation28] ss:$0 sm:$0xff] }
 0x7da   : > { %v3402_v61 = vrot.slane %v3388_v31, %v6394_v49  ;;  %v3434_v62 = vrot.slane %v3420_v29, %v6394_v49  ;;  %v3395_v1 = vrot.slane %v3387_v25, %v6394_v49  ;;  %v3427_v2 = vrot.slane %v3419_v28, %v6394_v49 }
 0x7db   : > { %v3291_v38 = vrot.slane %v3283_v20, %v6394_v49  ;;  %v3298_v50 = vrot.slane %v3284_v55, %v6394_v49  ;;  %v3307_v3 = vrot.slane %v3299_v14, %v6394_v49  ;;  %v3314_v4 = vrot.slane %v3300_v60, %v6394_v49 }
 0x7dc   : > { %v3453_v0 = vcombine.low %v3402_v61, %v3434_v62  ;;  %v3452_v58 = vcombine.high %v3395_v1, %v3427_v2  ;;  %v3454_v7 = vcombine.high %v3402_v61, %v3434_v62  ;;  %v3451_v9 = vcombine.low %v3395_v1, %v3427_v2 }
 0x7dd   : > { %v4007_v18 = vcombine.low %v3291_v38, %v3298_v50  ;;  %v4009_v32 = vcombine.high %v3291_v38, %v3298_v50  ;;  %v4011_v26 = vcombine.low %v3307_v3, %v3314_v4  ;;  %v4013_v19 = vcombine.high %v3307_v3, %v3314_v4 }
 0x7de   : > { %3464 = vrot.lane.b32.xlu0 %v3453_v0, %s5501_s4  ;;  %3460 = vrot.lane.b32.xlu1 %v3452_v58, %s5502_s5  ;;  %s6688_s4 = scalar_lea.hbm %s6915_s30, %s4018_s23 }
 0x7df   : > { %v3338_v21 = vrot.slane %v4007_v18, %v6390_v40  ;;  %v3354_v22 = vrot.slane %v4009_v32, %v6390_v40  ;;  %v3370_v57 = vrot.slane %v4011_v26, %v6390_v40  ;;  %v3386_v63 = vrot.slane %v4013_v19, %v6390_v40 }
 0x7e1   : > { %v3404_v51 = vcombine.high %v3338_v21, %v3354_v22  ;;  %v3436_v17 = vcombine.high %v3370_v57, %v3386_v63  ;;  %v3403_v13 = vcombine.low %v3338_v21, %v3354_v22  ;;  %v3435_v39 = vcombine.low %v3370_v57, %v3386_v63 }
 0x7e2   : > { %3468 = vrot.lane.b32.xlu1 %v3454_v7, %s5503_s12  ;;  %s5507_s12 = smov [#allocation29]  }
 0x7e3   : > { %v3418_v16 = vrot.slane %v3404_v51, %v6394_v49  ;;  %v3450_v12 = vrot.slane %v3436_v17, %v6394_v49  ;;  %v3411_v15 = vrot.slane %v3403_v13, %v6394_v49  ;;  %v3443_v33 = vrot.slane %v3435_v39, %v6394_v49 }
 0x7e5   : > { %v3457_v40 = vcombine.low %v3418_v16, %v3450_v12  ;;  %v3455_v34 = vcombine.low %v3411_v15, %v3443_v33  ;;  %v3456_v35 = vcombine.high %v3411_v15, %v3443_v33  ;;  %v3458_v36 = vcombine.high %v3418_v16, %v3450_v12 }
 0x7e7   : > { %3480 = vrot.lane.b32.xlu0 %v3457_v40, %s5504_s27  ;;  %3472 = vrot.lane.b32.xlu1 %v3455_v34, %s5493_s10  ;;  %s871_s10 = scalar_lea.vmem [#allocation29], %s3925_s17  ;;  %s5305_s27 = sshll.u32 %s5507_s12, 4  ;;  %s5306_s27 = int_to_ptr.vmem [resolvable:$false] %s5305_s27 }
 0x7e8   : > { %s3600_s16 = sshll.u32 %s871_s10, 4  ;;  %s6690_s16 = int_to_ptr.vmem [resolvable:$true] %s3600_s16 }
 0x7e9   : > { %s5301_s5 = scalar_lea.vmem %s6690_s16, 128  ;;  %p5308_p1 = scmp.lt.s32.totalorder %s6690_s16, %s5306_s27 }
 0x7ea   : > { %p5302_p3 = scmp.ne.s32.totalorder %s6690_s16, %s5301_s5 }
 0x7eb   : > { %3476 = vrot.lane.b32.xlu1 %v3456_v35, %s5505_s13  ;;  %s5307_s13 = scalar_lea.vmem %s5306_s27, 256 }
 0x7ec   : > { %p5303_p2 = pnand %p5302_p3, %p6917_p0  ;;  %p5309_p13 = scmp.lt.s32.totalorder %s5307_s13, %s5301_s5 }
 0x7ee   : > { %p5304_p5 = pneg %p5303_p2  ;;  %p5310_p6 = por %p5309_p13, %p5308_p1 }
 0x7ef   : > { %3484 = vrot.lane.b32.xlu1 %v3458_v36, %s5506_s20 }
 0x7f0   : > { %p5311_p11 = pnand %p5310_p6, %p5304_p5 }
 0x850   : > { %v3461_v24 = vpop.permute.xlu1 %3460  ;;  %v3465_v8 = vpop.permute.xlu0 %3464 }
 0x851   : > { %v3488_v41 = vsel %vm3487_vm5, %v3451_v9, %v3461_v24 }
 0x852   : > { %v3489_v27 = vsel %vm1301_vm2, %v3488_v41, %v3465_v8 }
 0x854   : > { %v3469_v37 = vpop.permute.xlu1 %3468 }
 0x855   : > { %v3491_v42 = vsel %vm3490_vm6, %v3489_v27, %v3469_v37 }
 0x859   : > { %v3473_v49 = vpop.permute.xlu1 %3472  ;;  %v3481_v46 = vpop.permute.xlu0 %3480 }
 0x85a   : > { %v3492_v43 = vsel %vm1926_vm4, %v3491_v42, %v3473_v49 }
 0x85d   : > { %v3477_v45 = vpop.permute.xlu1 %3476 }
 0x85e   : > { %v3494_v23 = vsel %vm3493_vm7, %v3492_v43, %v3477_v45 }
 0x85f   : > { %v3496_v48 = vsel %vm3495_vm8, %v3494_v23, %v3481_v46 }
 0x861   : > { %v3485_v47 = vpop.permute.xlu1 %3484 }
 0x862   : > { %v3498_v52 = vsel %vm3497_vm9, %v3496_v48, %v3485_v47 }
 0x863   : > { %4376 = vmatmul.mubr.msk.f32.vlgmr.msra.gmra.mrb[16].mxu1 %vm878_vm0, %v3498_v52 }
 0x936   : > { %v3579_v54 = vpop.f32.mrb[16].mxu1 }
 0x937   : > { %v3580_v56 = vadd.f32 %v4014_v53, %v3579_v54  ;;  %v4377_v59 = vpop.f32.mrb[17].mxu1 }
 0x939   : > { %3583 = vst.msk [vmem:[%s871_s10] sm:$0xff] %vm878_vm0, %v3580_v56 }
 0x93a   : > { %5314 = shalt.err (!%p5311_p11)
}
 0x93b   : > { %s5315_s28 = scalar_lea.hbm %s6688_s4, 128  ;;  %s5319_s17 = scalar_lea.hbm %s6916_s21, 512 }
 0x93c   : > { %p5316_p9 = scmp.ne.s32.totalorder %s6688_s4, %s5315_s28  ;;  %p5320_p4 = scmp.lt.u32.totalorder %s6688_s4, %s6916_s21 }
 0x93d   : > { %p5321_p10 = scmp.lt.u32.totalorder %s5319_s17, %s5315_s28  ;;  %p5323_p3 = scmp.lt.u32.totalorder %s5315_s28, %s6688_s4 }
 0x93e   : > { %p5317_p7 = pnand %p5316_p9, %p6917_p0 }
 0x93f   : > { %p5322_p12 = por %p5321_p10, %p5320_p4 }
 0x940   : > { %p5318_p8 = pneg %p5317_p7 }
 0x941   : > { %p5324_p2 = por %p5323_p3, %p5322_p12 }
 0x943   : > { %p5325_p5 = pnand %p5324_p2, %p5318_p8 }
 0x945   : > { %5328 = shalt.err (!%p5325_p5)
}
 0x946   : > { %4561 = dma.vmem_to_hbm [thread:$0]  (%p6917_p0), %s6690_s16, 128, %s6688_s4, %s3585_s29  }
 0x947 PF: > { %s6918_s23 = sld [smem:[#allocation41_spill]]  ;;  %s6919_s10 = sld [smem:[#allocation54_spill]] }
 0x948   : > { %p4647_p1 = scmp.ge.s32.totalorder %s5459_s1, 2 }
 0x94d   : > { %s3612_s26 = sand.u32 1, %s6918_s23   ;;  %p6920_p13 = scmp.ne.s32.totalorder %s6919_s10, 0 }
 0x94e   : > { %s3613_s9 = scalar_lea.sflag [#allocation4], %s3612_s26 }
 0x94f   : > { %p4617_p6 = pnand %p4647_p1, %p6920_p13 }
 0x951   : > { %5414 = dma.done.wait (!%p4617_p6), %s3613_s9, 128  }
 0x952   : > { %5416 = vsyncadd (!%p4617_p6), %s3613_s9, 4294967168  ;;  %s45_s1 = sadd.s32 1, %s5459_s1   ;;  %s6921_s30 = sld [smem:[#allocation42_spill]] }
 0x953   : > { %p42_p11 = scmp.ge.s32.totalorder %s45_s1, 6   ;;  %s6922_s26 = sld [smem:[#allocation55_spill]] }
 0x954   : > { %s6923_s27 = sld [smem:[#allocation44_spill]]  ;;  %s6924_s28 = sld [smem:[#allocation45_spill]] }
 0x955   : > { %s6925_s14 = sld [smem:[#allocation48_spill]]  ;;  %s6926_s18 = sld [smem:[#allocation50_spill]] }
 0x956   : > { %s6927_s16 = sld [smem:[#allocation51_spill]]  ;;  %s6928_s24 = smov %s5423_s25 }
 0x957   : > { %s6930_s29 = smov %s6062_s0  ;;  %44 = sbr.rel (!%p42_p11) target bundleno = 35 (0x23), region = 223 }
 0x958   : > { %s6929_s25 = smov %s6921_s30  ;;  %s6932_s30 = smov %s5455_s19 }
 0x95b   : > { %s6931_s0 = smov %s6925_s14 }
 0x95c   : > { %s6933_s19 = smov %s6927_s16 }
 0x95e   :  { %3618 = vsyncpa [#allocation3], 1 }
 0x95f   :  { %3620 = vsyncpa [#allocation3 + $0x1], 1 }
 0x960   :  { %3621 = vsyncpa [#allocation6], 1 }
 0x961   :  { %3623 = vsyncpa [#allocation6 + $0x1], 1 }
 0x962   :  { %3624 = vsyncpa [#allocation9], 1 }
 0x963   :  { %3626 = vsyncpa [#allocation9 + $0x1], 1 }
 0x964   :  { %3627 = vsyncpa [#allocation12], 1 }
 0x965   :  { %3628 = vsyncpa [#allocation15], 1 }
 0x966   :  { %3629 = vsyncpa [#allocation18], 1 }
 0x967   :  { %3630 = vsyncpa [#allocation21], 1 }
 0x968   :  { %3631 = vsyncpa [#allocation24], 1 }
 0x969   :  { %3632 = vsyncpa [#allocation27], 1 }
 0x96a   :  { %3633 = vsyncpa [#allocation4], 1 }
 0x96b   :  { %3635 = vsyncpa [#allocation4 + $0x1], 1 }

</bundles_post_ra>
